<compile_context>
chip_gen: v5e
topology: v5e:2x2
jax: 0.10.0
libtpu: 0.0.40
codegen_flags: <defaults>
</compile_context>

<pallas_src>
import jax
import jax.numpy as jnp
from jax.experimental import pallas as pl
from jax.experimental.pallas import tpu as pltpu

BN_EPS = 1e-5


# ---------------------------------------------------------------------------
# Kernel
# ---------------------------------------------------------------------------
def _make_fused_kernel(num_layers, wpp, w2, lout, lpad):
    """Builds the fused upsample + (conv3x3+ReLU+BN) x num_layers kernel.

    Layout: every activation is (C, flat) where flat indexes a zero-padded
    image whose rows have stride `wpp` (>= W2+2).  Output position
    q = h*wpp + w; tap (kh, kw) of the 3x3 conv is the static lane slice
    buf[:, q + kh*wpp + kw : ...], so the whole conv is one im2col matmul.
    """
    offsets = tuple(kh * wpp + kw for kh in range(3) for kw in range(3))
    pad_lo = wpp + 1                 # activation sits at padded coords (h+1, w+1)
    pad_hi = lpad - pad_lo - lout

    def kernel(x_ref, s_ref, m_ref, aff_ref, *rest):
        w_refs, o_ref = rest[:num_layers], rest[num_layers]

        # Fused nearest-x2 upsample + zero-pad + flatten: one-hot gather matmul
        # on the MXU (exact: every column of S holds at most a single 1.0).
        buf = jnp.dot(x_ref[0], s_ref[...],
                      preferred_element_type=jnp.float32)      # (Cin, Lpad)
        mask = m_ref[...]                                       # (1, Lout) 0/1

        y = None
        zeros_lo = None
        zeros_hi = None
        for l in range(num_layers):
            # im2col: 9 static lane slices of the zero-margin buffer, one
            # (Cout, 9*C) x (9*C, Lout) matmul (K = 9*C, single MXU push chain).
            patches = jnp.concatenate(
                [buf[:, off:off + lout] for off in offsets], axis=0)
            y = jnp.dot(w_refs[l][...], patches,
                        preferred_element_type=jnp.float32)     # (Cout, Lout)
            aff = aff_ref[l]                                    # (Cout, 3)
            y = jnp.maximum(y + aff[:, 0:1], 0.0)               # conv bias + ReLU
            y = y * aff[:, 1:2] + aff[:, 2:3]                   # folded inference BN
            if l + 1 < num_layers:
                # Re-embed as the next layer's zero-padded flat input
                # (stays in VMEM; pad lanes in y must be zeroed first).
                if zeros_lo is None:                            # hoist: built once
                    zeros_lo = jnp.zeros((y.shape[0], pad_lo), jnp.float32)
                    zeros_hi = jnp.zeros((y.shape[0], pad_hi), jnp.float32)
                buf = jnp.concatenate([zeros_lo, y * mask, zeros_hi], axis=1)

        o_ref[0] = y.astype(o_ref.dtype)

    return kernel


# ---------------------------------------------------------------------------
# Wrapper-side constant helpers (shape-dependent constants, folded by XLA)
# ---------------------------------------------------------------------------
def _upscale_geometry(h0, w0):
    h2, w2 = 2 * h0, 2 * w0
    wpp = w2 + 2                                  # padded row stride (>= W2 + 2)
    bump = (-(h2 * wpp)) % 128                    # lane-dense output if possible
    if bump % h2 == 0:
        wpp += bump // h2
    lout = h2 * wpp                               # output flat length
    lpad = lout + 2 * wpp + 2                     # padded-buffer flat length
    return h2, w2, wpp, lout, lpad


def _gather_matrix(h0, w0, h2, w2, wpp, lpad):
    """One-hot (H0*W0, Lpad) matrix fusing nearest-x2 upsample + pad + flatten."""
    t = jnp.arange(lpad, dtype=jnp.int32)
    r = t // wpp - 1                              # upsampled row
    c = t % wpp - 1                               # upsampled col
    valid = (r >= 0) & (r < h2) & (c >= 0) & (c < w2)
    src = jnp.where(valid, (r // 2) * w0 + (c // 2), -1)
    p = jnp.arange(h0 * w0, dtype=jnp.int32)
    return (p[:, None] == src[None, :]).astype(jnp.float32)


def _pad_mask(w2, wpp, lout):
    col = jnp.arange(lout, dtype=jnp.int32) % wpp
    return (col < w2).astype(jnp.float32).reshape(1, lout)


# ---------------------------------------------------------------------------
# Parameters (mirror the PyTorch module's shapes, deterministic)
# ---------------------------------------------------------------------------
def init_upscale_block_params(key, in_channels, out_channels, num_layers=2,
                              use_batchnorm=True):
    params = []
    cin = in_channels
    for _ in range(num_layers):
        key, kw, kb, kg, kbeta, km, kv = jax.random.split(key, 7)
        fan_in = cin * 9
        w = jax.random.normal(kw, (out_channels, cin, 3, 3), jnp.float32)
        w = w / jnp.sqrt(float(fan_in))                       # OIHW
        b = 0.1 * jax.random.normal(kb, (out_channels,), jnp.float32)
        if use_batchnorm:
            gamma = 1.0 + 0.1 * jax.random.normal(kg, (out_channels,), jnp.float32)
            beta = 0.1 * jax.random.normal(kbeta, (out_channels,), jnp.float32)
            mean = 0.1 * jax.random.normal(km, (out_channels,), jnp.float32)
            var = 1.0 + 0.1 * jax.random.uniform(kv, (out_channels,), jnp.float32)
        else:  # nn.Identity
            gamma = jnp.ones((out_channels,), jnp.float32)
            beta = jnp.zeros((out_channels,), jnp.float32)
            mean = jnp.zeros((out_channels,), jnp.float32)
            var = jnp.ones((out_channels,), jnp.float32) - BN_EPS
        params.append(dict(w=w, b=b, gamma=gamma, beta=beta, mean=mean, var=var))
        cin = out_channels
    return params


# ---------------------------------------------------------------------------
# Forward (matches UpscaleBlock.forward: NCHW in, NCHW out)
# ---------------------------------------------------------------------------
@jax.jit
def upscale_block_forward(x_nchw, params):
    n, cin, h0, w0 = x_nchw.shape
    num_layers = len(params)
    cout = params[0]["w"].shape[0]
    h2, w2, wpp, lout, lpad = _upscale_geometry(h0, w0)

    x_flat = x_nchw.reshape(n, cin, h0 * w0)                  # free reshape
    s_mat = _gather_matrix(h0, w0, h2, w2, wpp, lpad)         # compile-time const
    mask = _pad_mask(w2, wpp, lout)                           # compile-time const

    w_mats, affs = [], []
    flops_per_img = 2 * cin * (h0 * w0) * lpad
    cin_l = cin
    for layer in params:
        # OIHW -> (Cout, 3, 3, Cin) -> (Cout, 9*Cin), tap-major / cin-minor.
        w_mats.append(jnp.transpose(layer["w"], (0, 2, 3, 1)).reshape(cout, -1))
        scale = layer["gamma"] / jnp.sqrt(layer["var"] + BN_EPS)
        shift = layer["beta"] - layer["mean"] * scale
        affs.append(jnp.stack([layer["b"], scale, shift], axis=1))  # (Cout, 3)
        flops_per_img += 2 * cout * (9 * cin_l) * lout
        cin_l = cout
    aff = jnp.stack(affs, axis=0)                             # (L, Cout, 3)

    kernel = _make_fused_kernel(num_layers, wpp, w2, lout, lpad)

    in_specs = [
        pl.BlockSpec((1, cin, h0 * w0), lambda nn: (nn, 0, 0)),      # x (per image)
        pl.BlockSpec((h0 * w0, lpad), lambda nn: (0, 0)),            # gather matrix
        pl.BlockSpec((1, lout), lambda nn: (0, 0)),                  # pad mask
        pl.BlockSpec((num_layers, cout, 3), lambda nn: (0, 0, 0)),   # bias/scale/shift
    ]
    for wm in w_mats:
        in_specs.append(pl.BlockSpec(wm.shape, lambda nn: (0, 0)))   # per-layer weights

    bytes_accessed = (x_flat.size + n * cout * lout + s_mat.size + mask.size
                      + aff.size + sum(wm.size for wm in w_mats)) * 4

    out_flat = pl.pallas_call(
        kernel,
        out_shape=jax.ShapeDtypeStruct((n, cout, lout), x_nchw.dtype),
        grid_spec=pltpu.PrefetchScalarGridSpec(
            num_scalar_prefetch=0,
            grid=(n,),
            in_specs=in_specs,
            out_specs=pl.BlockSpec((1, cout, lout), lambda nn: (nn, 0, 0)),
        ),
        compiler_params=pltpu.CompilerParams(
            dimension_semantics=("parallel",),
            vmem_limit_bytes=32 * 1024 * 1024,
        ),
        cost_estimate=pl.CostEstimate(
            flops=n * flops_per_img,
            transcendentals=0,
            bytes_accessed=bytes_accessed,
        ),
    )(x_flat, s_mat, mask, aff, *w_mats)

    # (N, Cout, H2*Wpp) -> (N, Cout, H2, Wpp) -> drop pad lanes -> NCHW.
    return out_flat.reshape(n, cout, h2, wpp)[:, :, :, :w2]


# ---------------------------------------------------------------------------
# Pure-JAX reference (lax.conv) for correctness checking
# ---------------------------------------------------------------------------
def _reference_forward(x_nchw, params):
    x = jnp.repeat(jnp.repeat(x_nchw, 2, axis=2), 2, axis=3)
    for layer in params:
        x = jax.lax.conv_general_dilated(
            x, layer["w"], window_strides=(1, 1), padding="SAME",
            dimension_numbers=("NCHW", "OIHW", "NCHW"),
            precision=jax.lax.Precision.HIGHEST)
        x = x + layer["b"][None, :, None, None]
        x = jnp.maximum(x, 0.0)
        scale = layer["gamma"] / jnp.sqrt(layer["var"] + BN_EPS)
        shift = layer["beta"] - layer["mean"] * scale
        x = x * scale[None, :, None, None] + shift[None, :, None, None]
    return x


if __name__ == "__main__":
    N, C_IN, H, W = 2, 4, 16, 16
    C_OUT = 8
    NUM_LAYERS = 2
    USE_BN = True

    key = jax.random.PRNGKey(0)
    key, kx = jax.random.split(key)
    x = jax.random.normal(kx, (N, C_IN, H, W), jnp.float32)

    params = init_upscale_block_params(key, C_IN, C_OUT,
                                       num_layers=NUM_LAYERS,
                                       use_batchnorm=USE_BN)

    out = jax.block_until_ready(upscale_block_forward(x, params))
    assert out.shape == (N, C_OUT, 2 * H, 2 * W), out.shape

    ref = jax.block_until_ready(_reference_forward(x, params))
    if not jnp.allclose(out, ref, atol=1e-3, rtol=1e-3):
        raise AssertionError("Pallas kernel output mismatch vs reference")

    print("KERNEL_OK")
</pallas_src>

<mosaic_0001>
module attributes {stable_mosaic.version = 11 : i64} {
  func.func @kernel(%arg0: i32, %arg1: memref<1x4x256xf32, #tpu.memory_space<vmem>>, %arg2: memref<256x1226xf32, #tpu.memory_space<vmem>>, %arg3: memref<1x1152xf32, #tpu.memory_space<vmem>>, %arg4: memref<2x8x3xf32, #tpu.memory_space<vmem>>, %arg5: memref<8x36xf32, #tpu.memory_space<vmem>>, %arg6: memref<8x72xf32, #tpu.memory_space<vmem>>, %arg7: memref<1x8x1152xf32, #tpu.memory_space<vmem>>) attributes {dimension_semantics = [#tpu.dimension_semantics<parallel>], iteration_bounds = array<i64: 2>, scalar_prefetch = 0 : i64, scratch_operands = 0 : i64, tpu.core_type = #tpu.core_type<tc>, window_params = [{transform_indices = @transform_0, window_bounds = array<i64: 1, 4, 256>}, {pipeline_mode = #tpu.pipeline_mode<synchronous>, transform_indices = @transform_1, window_bounds = array<i64: 256, 1226>}, {pipeline_mode = #tpu.pipeline_mode<synchronous>, transform_indices = @transform_2, window_bounds = array<i64: 1, 1152>}, {pipeline_mode = #tpu.pipeline_mode<synchronous>, transform_indices = @transform_3, window_bounds = array<i64: 2, 8, 3>}, {pipeline_mode = #tpu.pipeline_mode<synchronous>, transform_indices = @transform_4, window_bounds = array<i64: 8, 36>}, {pipeline_mode = #tpu.pipeline_mode<synchronous>, transform_indices = @transform_5, window_bounds = array<i64: 8, 72>}, {transform_indices = @transform_6, window_bounds = array<i64: 1, 8, 1152>}]} {
    %c0 = arith.constant 0 : index
    %c0_0 = arith.constant 0 : index
    %c0_1 = arith.constant 0 : index
    %0 = vector.load %arg1[%c0, %c0_0, %c0_1] : memref<1x4x256xf32, #tpu.memory_space<vmem>>, vector<1x4x256xf32>
    %1 = vector.shape_cast %0 : vector<1x4x256xf32> to vector<4x256xf32>
    %c0_2 = arith.constant 0 : index
    %c0_3 = arith.constant 0 : index
    %2 = vector.load %arg2[%c0_2, %c0_3] : memref<256x1226xf32, #tpu.memory_space<vmem>>, vector<256x1226xf32>
    %cst = arith.constant dense<0.000000e+00> : vector<4x1226xf32>
    %3 = tpu.matmul %1, %2, %cst {dimension_numbers = #tpu.dot_dimension_numbers<[1], [0], [0], [1], [0, 0, 1, 1], [], []>} : vector<4x256xf32>, vector<256x1226xf32>, vector<4x1226xf32> -> vector<4x1226xf32>
    %c0_4 = arith.constant 0 : index
    %c0_5 = arith.constant 0 : index
    %4 = vector.load %arg3[%c0_4, %c0_5] : memref<1x1152xf32, #tpu.memory_space<vmem>>, vector<1x1152xf32>
    %5 = vector.extract_strided_slice %3 {offsets = [0, 0], sizes = [4, 1152], strides = [1, 1]} : vector<4x1226xf32> to vector<4x1152xf32>
    %6 = vector.extract_strided_slice %3 {offsets = [0, 1], sizes = [4, 1152], strides = [1, 1]} : vector<4x1226xf32> to vector<4x1152xf32>
    %7 = vector.extract_strided_slice %3 {offsets = [0, 2], sizes = [4, 1152], strides = [1, 1]} : vector<4x1226xf32> to vector<4x1152xf32>
    %8 = vector.extract_strided_slice %3 {offsets = [0, 36], sizes = [4, 1152], strides = [1, 1]} : vector<4x1226xf32> to vector<4x1152xf32>
    %9 = vector.extract_strided_slice %3 {offsets = [0, 37], sizes = [4, 1152], strides = [1, 1]} : vector<4x1226xf32> to vector<4x1152xf32>
    %10 = vector.extract_strided_slice %3 {offsets = [0, 38], sizes = [4, 1152], strides = [1, 1]} : vector<4x1226xf32> to vector<4x1152xf32>
    %11 = vector.extract_strided_slice %3 {offsets = [0, 72], sizes = [4, 1152], strides = [1, 1]} : vector<4x1226xf32> to vector<4x1152xf32>
    %12 = vector.extract_strided_slice %3 {offsets = [0, 73], sizes = [4, 1152], strides = [1, 1]} : vector<4x1226xf32> to vector<4x1152xf32>
    %13 = vector.extract_strided_slice %3 {offsets = [0, 74], sizes = [4, 1152], strides = [1, 1]} : vector<4x1226xf32> to vector<4x1152xf32>
    %14 = tpu.concatenate %5, %6, %7, %8, %9, %10, %11, %12, %13 in 0 : vector<4x1152xf32>, vector<4x1152xf32>, vector<4x1152xf32>, vector<4x1152xf32>, vector<4x1152xf32>, vector<4x1152xf32>, vector<4x1152xf32>, vector<4x1152xf32>, vector<4x1152xf32> -> vector<36x1152xf32>
    %c0_6 = arith.constant 0 : index
    %c0_7 = arith.constant 0 : index
    %15 = vector.load %arg5[%c0_6, %c0_7] : memref<8x36xf32, #tpu.memory_space<vmem>>, vector<8x36xf32>
    %cst_8 = arith.constant dense<0.000000e+00> : vector<8x1152xf32>
    %16 = tpu.matmul %15, %14, %cst_8 {dimension_numbers = #tpu.dot_dimension_numbers<[1], [0], [0], [1], [0, 0, 1, 1], [], []>} : vector<8x36xf32>, vector<36x1152xf32>, vector<8x1152xf32> -> vector<8x1152xf32>
    %c0_9 = arith.constant 0 : index
    %c0_10 = arith.constant 0 : index
    %c0_11 = arith.constant 0 : index
    %17 = vector.load %arg4[%c0_9, %c0_10, %c0_11] : memref<2x8x3xf32, #tpu.memory_space<vmem>>, vector<1x8x3xf32>
    %18 = vector.shape_cast %17 : vector<1x8x3xf32> to vector<8x3xf32>
    %19 = vector.extract_strided_slice %18 {offsets = [0, 0], sizes = [8, 1], strides = [1, 1]} : vector<8x3xf32> to vector<8x1xf32>
    %20 = vector.broadcast %19 : vector<8x1xf32> to vector<8x1152xf32>
    %21 = arith.addf %16, %20 : vector<8x1152xf32>
    %cst_12 = arith.constant 0.000000e+00 : f32
    %22 = vector.broadcast %cst_12 : f32 to vector<8x1152xf32>
    %23 = arith.maximumf %21, %22 : vector<8x1152xf32>
    %24 = vector.extract_strided_slice %18 {offsets = [0, 1], sizes = [8, 1], strides = [1, 1]} : vector<8x3xf32> to vector<8x1xf32>
    %25 = vector.broadcast %24 : vector<8x1xf32> to vector<8x1152xf32>
    %26 = arith.mulf %23, %25 : vector<8x1152xf32>
    %27 = vector.extract_strided_slice %18 {offsets = [0, 2], sizes = [8, 1], strides = [1, 1]} : vector<8x3xf32> to vector<8x1xf32>
    %28 = vector.broadcast %27 : vector<8x1xf32> to vector<8x1152xf32>
    %29 = arith.addf %26, %28 : vector<8x1152xf32>
    %cst_13 = arith.constant 0.000000e+00 : f32
    %30 = vector.broadcast %cst_13 : f32 to vector<8x37xf32>
    %cst_14 = arith.constant 0.000000e+00 : f32
    %31 = vector.broadcast %cst_14 : f32 to vector<8x37xf32>
    %32 = vector.broadcast %4 : vector<1x1152xf32> to vector<8x1152xf32>
    %33 = arith.mulf %29, %32 : vector<8x1152xf32>
    %34 = tpu.concatenate %30, %33, %31 in 1 : vector<8x37xf32>, vector<8x1152xf32>, vector<8x37xf32> -> vector<8x1226xf32>
    %35 = vector.extract_strided_slice %34 {offsets = [0, 0], sizes = [8, 1152], strides = [1, 1]} : vector<8x1226xf32> to vector<8x1152xf32>
    %36 = vector.extract_strided_slice %34 {offsets = [0, 1], sizes = [8, 1152], strides = [1, 1]} : vector<8x1226xf32> to vector<8x1152xf32>
    %37 = vector.extract_strided_slice %34 {offsets = [0, 2], sizes = [8, 1152], strides = [1, 1]} : vector<8x1226xf32> to vector<8x1152xf32>
    %38 = vector.extract_strided_slice %34 {offsets = [0, 36], sizes = [8, 1152], strides = [1, 1]} : vector<8x1226xf32> to vector<8x1152xf32>
    %39 = vector.extract_strided_slice %34 {offsets = [0, 37], sizes = [8, 1152], strides = [1, 1]} : vector<8x1226xf32> to vector<8x1152xf32>
    %40 = vector.extract_strided_slice %34 {offsets = [0, 38], sizes = [8, 1152], strides = [1, 1]} : vector<8x1226xf32> to vector<8x1152xf32>
    %41 = vector.extract_strided_slice %34 {offsets = [0, 72], sizes = [8, 1152], strides = [1, 1]} : vector<8x1226xf32> to vector<8x1152xf32>
    %42 = vector.extract_strided_slice %34 {offsets = [0, 73], sizes = [8, 1152], strides = [1, 1]} : vector<8x1226xf32> to vector<8x1152xf32>
    %43 = vector.extract_strided_slice %34 {offsets = [0, 74], sizes = [8, 1152], strides = [1, 1]} : vector<8x1226xf32> to vector<8x1152xf32>
    %44 = tpu.concatenate %35, %36, %37, %38, %39, %40, %41, %42, %43 in 0 : vector<8x1152xf32>, vector<8x1152xf32>, vector<8x1152xf32>, vector<8x1152xf32>, vector<8x1152xf32>, vector<8x1152xf32>, vector<8x1152xf32>, vector<8x1152xf32>, vector<8x1152xf32> -> vector<72x1152xf32>
    %c0_15 = arith.constant 0 : index
    %c0_16 = arith.constant 0 : index
    %45 = vector.load %arg6[%c0_15, %c0_16] : memref<8x72xf32, #tpu.memory_space<vmem>>, vector<8x72xf32>
    %cst_17 = arith.constant dense<0.000000e+00> : vector<8x1152xf32>
    %46 = tpu.matmul %45, %44, %cst_17 {dimension_numbers = #tpu.dot_dimension_numbers<[1], [0], [0], [1], [0, 0, 1, 1], [], []>} : vector<8x72xf32>, vector<72x1152xf32>, vector<8x1152xf32> -> vector<8x1152xf32>
    %c1 = arith.constant 1 : index
    %c0_18 = arith.constant 0 : index
    %c0_19 = arith.constant 0 : index
    %47 = vector.load %arg4[%c1, %c0_18, %c0_19] : memref<2x8x3xf32, #tpu.memory_space<vmem>>, vector<1x8x3xf32>
    %48 = vector.shape_cast %47 : vector<1x8x3xf32> to vector<8x3xf32>
    %49 = vector.extract_strided_slice %48 {offsets = [0, 0], sizes = [8, 1], strides = [1, 1]} : vector<8x3xf32> to vector<8x1xf32>
    %50 = vector.broadcast %49 : vector<8x1xf32> to vector<8x1152xf32>
    %51 = arith.addf %46, %50 : vector<8x1152xf32>
    %cst_20 = arith.constant 0.000000e+00 : f32
    %52 = vector.broadcast %cst_20 : f32 to vector<8x1152xf32>
    %53 = arith.maximumf %51, %52 : vector<8x1152xf32>
    %54 = vector.extract_strided_slice %48 {offsets = [0, 1], sizes = [8, 1], strides = [1, 1]} : vector<8x3xf32> to vector<8x1xf32>
    %55 = vector.broadcast %54 : vector<8x1xf32> to vector<8x1152xf32>
    %56 = arith.mulf %53, %55 : vector<8x1152xf32>
    %57 = vector.extract_strided_slice %48 {offsets = [0, 2], sizes = [8, 1], strides = [1, 1]} : vector<8x3xf32> to vector<8x1xf32>
    %58 = vector.broadcast %57 : vector<8x1xf32> to vector<8x1152xf32>
    %59 = arith.addf %56, %58 : vector<8x1152xf32>
    %c0_21 = arith.constant 0 : index
    %c0_22 = arith.constant 0 : index
    %c0_23 = arith.constant 0 : index
    %60 = vector.load %arg7[%c0_21, %c0_22, %c0_23] : memref<1x8x1152xf32, #tpu.memory_space<vmem>>, vector<1x8x1152xf32>
    %61 = vector.shape_cast %60 : vector<1x8x1152xf32> to vector<8x1152xf32>
    %62 = vector.shape_cast %59 : vector<8x1152xf32> to vector<1x8x1152xf32>
    tpu.vector_store %arg7[%c0_21, %c0_22, %c0_23], %62 {strides = array<i32>} : memref<1x8x1152xf32, #tpu.memory_space<vmem>>, vector<1x8x1152xf32>,
    return
  }
  func.func @transform_0(%arg0: i32) -> (i32, i32, i32) {
    %c0_i32 = arith.constant 0 : i32
    %c0_i32_0 = arith.constant 0 : i32
    %c0_i32_1 = arith.constant 0 : i32
    return %arg0, %c0_i32, %c0_i32_0 : i32, i32, i32
  }
  func.func @transform_1(%arg0: i32) -> (i32, i32) {
    %c0_i32 = arith.constant 0 : i32
    %c0_i32_0 = arith.constant 0 : i32
    %c0_i32_1 = arith.constant 0 : i32
    return %c0_i32, %c0_i32_0 : i32, i32
  }
  func.func @transform_2(%arg0: i32) -> (i32, i32) {
    %c0_i32 = arith.constant 0 : i32
    %c0_i32_0 = arith.constant 0 : i32
    %c0_i32_1 = arith.constant 0 : i32
    return %c0_i32, %c0_i32_0 : i32, i32
  }
  func.func @transform_3(%arg0: i32) -> (i32, i32, i32) {
    %c0_i32 = arith.constant 0 : i32
    %c0_i32_0 = arith.constant 0 : i32
    %c0_i32_1 = arith.constant 0 : i32
    %c0_i32_2 = arith.constant 0 : i32
    return %c0_i32, %c0_i32_0, %c0_i32_1 : i32, i32, i32
  }
  func.func @transform_4(%arg0: i32) -> (i32, i32) {
    %c0_i32 = arith.constant 0 : i32
    %c0_i32_0 = arith.constant 0 : i32
    %c0_i32_1 = arith.constant 0 : i32
    return %c0_i32, %c0_i32_0 : i32, i32
  }
  func.func @transform_5(%arg0: i32) -> (i32, i32) {
    %c0_i32 = arith.constant 0 : i32
    %c0_i32_0 = arith.constant 0 : i32
    %c0_i32_1 = arith.constant 0 : i32
    return %c0_i32, %c0_i32_0 : i32, i32
  }
  func.func @transform_6(%arg0: i32) -> (i32, i32, i32) {
    %c0_i32 = arith.constant 0 : i32
    %c0_i32_0 = arith.constant 0 : i32
    %c0_i32_1 = arith.constant 0 : i32
    return %arg0, %c0_i32, %c0_i32_0 : i32, i32, i32
  }
}

</mosaic_0001>

<bundles_post_ra>
// kernel: upscale_block_forward.1
= control target key start
LH: loop header
LB: loop body
LE: loop exit
PB: predicated region body
PF: predicated region fallthrough
CT: control target
= control target key end

     0   :  { %s2780_s21 = smov 0   ;;  %s4676_s0 = inlined_call_operand.vmem [shape: f32[2,4,256], index: 0, kind: input, shape index: {}]   ;;  %s4677_s1 = inlined_call_operand.vmem [shape: f32[256,1226], index: 1, kind: input, shape index: {}]   ;;  %s4678_s2 = inlined_call_operand.vmem [shape: f32[1,1152], index: 2, kind: input, shape index: {}]   ;;  %s4679_s3 = inlined_call_operand.vmem [shape: f32[2,8,3], index: 3, kind: input, shape index: {}]   ;;  %s4680_s4 = inlined_call_operand.vmem [shape: f32[8,36], index: 4, kind: input, shape index: {}]   ;;  %s4681_s5 = inlined_call_operand.vmem [shape: f32[8,72], index: 5, kind: input, shape index: {}]   ;;  %s4682_s6 = inlined_call_operand.vmem [shape: f32[2,8,1152], index: 6, kind: output, shape index: {}]  }
   0x1 LB: > { %s2259_s22 = sadd.s32 4294967295, %s2731_s21   ;;  %p2263_p0 = scmp.ge.s32.totalorder %s2731_s21, 1  ;;  %s2731_s21 = sphi %s2780_s21, %s16_s21  }
   0x2   : > { %p212_p1 = scmp.lt.s32.totalorder %s2731_s21, 3 }
   0x4   : > { %p213_p2 = pnand %p2263_p0, %p212_p1 }
   0x5   : > { %p2850_p3 = scmp.lt.s32.totalorder (!%p213_p2), %s2259_s22, 1  ;;  %s2733_s7 = smov (!%p213_p2), 91  }
   0x6   : > { %216 = sbr.rel (%p213_p2) target bundleno = 1057 (0x421), region = 44  ;;  %s2734_s8 = smov (!%p213_p2), 54  }
   0x7   : > { %s2736_s9 = smov (!%p213_p2), 127   ;;  %s2737_s10 = smov (!%p213_p2), 126  }
   0x8   : > { %s2738_s11 = smov (!%p213_p2), 56   ;;  %s2739_s12 = smov (!%p213_p2), 55  }
   0x9   : > { %s2740_s13 = smov (!%p213_p2), 90   ;;  %s2744_s20 = smov (!%p213_p2), 37  }
   0xb   : > { %v403_v0 = vld [vmem:[%s4677_s1 + $0x4b0] sm:$0xff]  ;;  %v404_v2 = vld [vmem:[%s4677_s1 + $0x4b8] sm:$0xff]  ;;  %v393_v4 = vld [vmem:[%s4677_s1 + $0x460] sm:$0xff]  ;;  %s4685_s22 = smov (!%p2850_p3, %s2259_s22), 1  ;;  %vm1060_vm0 = vcmask 1031168   ;;  %vm1294_vm1 = vcmask 441344  }
   0xc   : > { %v563_v1 = vld [vmem:[%s4677_s1 + $0x9b0] sm:$0xff]  ;;  %579 = vmatpush.msra.mxu0 %v403_v0  ;;  %v564_v3 = vld [vmem:[%s4677_s1 + $0x9b8] sm:$0xff]  ;;  %v553_v5 = vld [vmem:[%s4677_s1 + $0x960] sm:$0xff]  ;;  %619 = vmatpush.msra.mxu2 %v404_v2  ;;  %s2299_s30 = sshll.u32 %s4685_s22, 3  ;;  %vm1304_vm2 = vcmask 1043456   ;;  %vm1099_vm3 = vcmask 752640  }
   0xd   : > { %599 = vmatpush.msra.mxu1 %v563_v1  ;;  %639 = vmatpush.msra.mxu3 %v564_v3  ;;  %v394_v6 = vld [vmem:[%s4677_s1 + $0x468] sm:$0xff]  ;;  %v383_v8 = vld [vmem:[%s4677_s1 + $0x410] sm:$0xff]  ;;  %v384_v10 = vld [vmem:[%s4677_s1 + $0x418] sm:$0xff]  ;;  %s246_s23 = scalar_lea.vmem %s4676_s0, %s2299_s30  ;;  %s2735_s30 = smov 92   ;;  %vm1138_vm4 = vcmask 744448   ;;  %vm1216_vm5 = vcmask 457728  }
   0xe   : > { %v554_v7 = vld [vmem:[%s4677_s1 + $0x968] sm:$0xff]  ;;  %580 = vmatpush.msra.mxu0 %v393_v4  ;;  %v543_v9 = vld [vmem:[%s4677_s1 + $0x910] sm:$0xff]  ;;  %v544_v11 = vld [vmem:[%s4677_s1 + $0x918] sm:$0xff]  ;;  %620 = vmatpush.msra.mxu2 %v394_v6  ;;  %vm1255_vm6 = vcmask 449536   ;;  %vm1177_vm7 = vcmask 736256   ;;  %vm1021_vm8 = vcmask 1039360  }
   0xf   : > { %600 = vmatpush.msra.mxu1 %v553_v5  ;;  %640 = vmatpush.msra.mxu3 %v554_v7  ;;  %v373_v12 = vld [vmem:[%s4677_s1 + $0x3c0] sm:$0xff]  ;;  %v374_v14 = vld [vmem:[%s4677_s1 + $0x3c8] sm:$0xff]  ;;  %v363_v16 = vld [vmem:[%s4677_s1 + $0x370] sm:$0xff]  ;;  %vm1348_vm9 = vcmask 293888   ;;  %vm1641_vm10 = vcmask 302080   ;;  %vm1976_vm12 = vcmask 588800  }
  0x10   : > { %v533_v13 = vld [vmem:[%s4677_s1 + $0x8c0] sm:$0xff]  ;;  %581 = vmatpush.msra.mxu0 %v383_v8  ;;  %v534_v15 = vld [vmem:[%s4677_s1 + $0x8c8] sm:$0xff]  ;;  %621 = vmatpush.msra.mxu2 %v384_v10  ;;  %v523_v17 = vld [vmem:[%s4677_s1 + $0x870] sm:$0xff]  ;;  %s2300_s29 = smul.u32 72, %s4685_s22 }
  0x11   : > { %601 = vmatpush.msra.mxu1 %v543_v9  ;;  %641 = vmatpush.msra.mxu3 %v544_v11  ;;  %v364_v18 = vld [vmem:[%s4677_s1 + $0x378] sm:$0xff]  ;;  %v353_v20 = vld [vmem:[%s4677_s1 + $0x320] sm:$0xff]  ;;  %v354_v22 = vld [vmem:[%s4677_s1 + $0x328] sm:$0xff] }
  0x12   : > { %582 = vmatpush.msra.mxu0 %v373_v12  ;;  %v524_v19 = vld [vmem:[%s4677_s1 + $0x878] sm:$0xff]  ;;  %622 = vmatpush.msra.mxu2 %v374_v14  ;;  %v513_v21 = vld [vmem:[%s4677_s1 + $0x820] sm:$0xff]  ;;  %v514_v23 = vld [vmem:[%s4677_s1 + $0x828] sm:$0xff] }
  0x13   : > { %602 = vmatpush.msra.mxu1 %v533_v13  ;;  %642 = vmatpush.msra.mxu3 %v534_v15  ;;  %v343_v24 = vld [vmem:[%s4677_s1 + $0x2d0] sm:$0xff]  ;;  %v344_v26 = vld [vmem:[%s4677_s1 + $0x2d8] sm:$0xff]  ;;  %v333_v28 = vld [vmem:[%s4677_s1 + $0x280] sm:$0xff] }
  0x14   : > { %583 = vmatpush.msra.mxu0 %v363_v16  ;;  %623 = vmatpush.msra.mxu2 %v364_v18  ;;  %v503_v25 = vld [vmem:[%s4677_s1 + $0x7d0] sm:$0xff]  ;;  %v504_v27 = vld [vmem:[%s4677_s1 + $0x7d8] sm:$0xff]  ;;  %v493_v29 = vld [vmem:[%s4677_s1 + $0x780] sm:$0xff] }
  0x15   : > { %603 = vmatpush.msra.mxu1 %v523_v17  ;;  %643 = vmatpush.msra.mxu3 %v524_v19  ;;  %v334_v30 = vld [vmem:[%s4677_s1 + $0x288] sm:$0xff]  ;;  %v323_v32 = vld [vmem:[%s4677_s1 + $0x230] sm:$0xff]  ;;  %v324_v34 = vld [vmem:[%s4677_s1 + $0x238] sm:$0xff] }
  0x16   : > { %584 = vmatpush.msra.mxu0 %v353_v20  ;;  %624 = vmatpush.msra.mxu2 %v354_v22  ;;  %v494_v31 = vld [vmem:[%s4677_s1 + $0x788] sm:$0xff]  ;;  %v483_v33 = vld [vmem:[%s4677_s1 + $0x730] sm:$0xff]  ;;  %v484_v35 = vld [vmem:[%s4677_s1 + $0x738] sm:$0xff] }
  0x17   : > { %604 = vmatpush.msra.mxu1 %v513_v21  ;;  %644 = vmatpush.msra.mxu3 %v514_v23  ;;  %v313_v36 = vld [vmem:[%s4677_s1 + $0x1e0] sm:$0xff]  ;;  %v314_v38 = vld [vmem:[%s4677_s1 + $0x1e8] sm:$0xff]  ;;  %v303_v40 = vld [vmem:[%s4677_s1 + $0x190] sm:$0xff] }
  0x18   : > { %585 = vmatpush.msra.mxu0 %v343_v24  ;;  %625 = vmatpush.msra.mxu2 %v344_v26  ;;  %v473_v37 = vld [vmem:[%s4677_s1 + $0x6e0] sm:$0xff]  ;;  %v474_v39 = vld [vmem:[%s4677_s1 + $0x6e8] sm:$0xff]  ;;  %v463_v41 = vld [vmem:[%s4677_s1 + $0x690] sm:$0xff] }
  0x19   : > { %605 = vmatpush.msra.mxu1 %v503_v25  ;;  %645 = vmatpush.msra.mxu3 %v504_v27  ;;  %v304_v42 = vld [vmem:[%s4677_s1 + $0x198] sm:$0xff]  ;;  %v293_v44 = vld [vmem:[%s4677_s1 + $0x140] sm:$0xff]  ;;  %v294_v46 = vld [vmem:[%s4677_s1 + $0x148] sm:$0xff] }
  0x1a   : > { %586 = vmatpush.msra.mxu0 %v333_v28  ;;  %626 = vmatpush.msra.mxu2 %v334_v30  ;;  %v464_v43 = vld [vmem:[%s4677_s1 + $0x698] sm:$0xff]  ;;  %v453_v45 = vld [vmem:[%s4677_s1 + $0x640] sm:$0xff]  ;;  %v454_v47 = vld [vmem:[%s4677_s1 + $0x648] sm:$0xff] }
  0x1b   : > { %606 = vmatpush.msra.mxu1 %v493_v29  ;;  %646 = vmatpush.msra.mxu3 %v494_v31  ;;  %v252_v48 = vld [vmem:[%s246_s23] sm:$0xff]  ;;  %v283_v49 = vld [vmem:[%s4677_s1 + $0xf0] sm:$0xff]  ;;  %v284_v51 = vld [vmem:[%s4677_s1 + $0xf8] sm:$0xff] }
  0x1c   : > { %587 = vmatpush.msra.mxu0 %v323_v32  ;;  %627 = vmatpush.msra.mxu2 %v324_v34  ;;  %v443_v50 = vld [vmem:[%s4677_s1 + $0x5f0] sm:$0xff]  ;;  %574 = vst [vmem:[#allocation1] ss:$2 sm:$0xff] %v252_v48  ;;  %v444_v52 = vld [vmem:[%s4677_s1 + $0x5f8] sm:$0xff]  ;;  %v273_v53 = vld [vmem:[%s4677_s1 + $0xa0] sm:$0xff] }
  0x1d   : > { %607 = vmatpush.msra.mxu1 %v483_v33  ;;  %647 = vmatpush.msra.mxu3 %v484_v35  ;;  %v433_v54 = vld [vmem:[%s4677_s1 + $0x5a0] sm:$0xff]  ;;  %v274_v55 = vld [vmem:[%s4677_s1 + $0xa8] sm:$0xff]  ;;  %v263_v57 = vld [vmem:[%s4677_s1 + $0x50] sm:$0xff] }
  0x1e   : > { %588 = vmatpush.msra.mxu0 %v313_v36  ;;  %628 = vmatpush.msra.mxu2 %v314_v38  ;;  %v434_v56 = vld [vmem:[%s4677_s1 + $0x5a8] sm:$0xff]  ;;  %v423_v58 = vld [vmem:[%s4677_s1 + $0x550] sm:$0xff]  ;;  %v264_v59 = vld [vmem:[%s4677_s1 + $0x58] sm:$0xff] }
  0x1f   : > { %608 = vmatpush.msra.mxu1 %v473_v37  ;;  %648 = vmatpush.msra.mxu3 %v474_v39  ;;  %v424_v60 = vld [vmem:[%s4677_s1 + $0x558] sm:$0xff]  ;;  %v253_v61 = vld [vmem:[%s4677_s1] sm:$0xff]  ;;  %v254_v63 = vld [vmem:[%s4677_s1 + $0x8] sm:$0xff] }
  0x20   : > { %589 = vmatpush.msra.mxu0 %v303_v40  ;;  %629 = vmatpush.msra.mxu2 %v304_v42  ;;  %v413_v62 = vld [vmem:[%s4677_s1 + $0x500] sm:$0xff]  ;;  %v414_v0 = vld [vmem:[%s4677_s1 + $0x508] sm:$0xff]  ;;  %v395_v7 = vld [vmem:[%s4677_s1 + $0x470] sm:$0xff] }
  0x21   : > { %609 = vmatpush.msra.mxu1 %v463_v41  ;;  %649 = vmatpush.msra.mxu3 %v464_v43  ;;  %v405_v3 = vld [vmem:[%s4677_s1 + $0x4c0] sm:$0xff]  ;;  %v406_v5 = vld [vmem:[%s4677_s1 + $0x4c8] sm:$0xff]  ;;  %v555_v8 = vld [vmem:[%s4677_s1 + $0x970] sm:$0xff] }
  0x22   : > { %590 = vmatpush.msra.mxu0 %v293_v44  ;;  %630 = vmatpush.msra.mxu2 %v294_v46  ;;  %v565_v4 = vld [vmem:[%s4677_s1 + $0x9c0] sm:$0xff]  ;;  %v566_v6 = vld [vmem:[%s4677_s1 + $0x9c8] sm:$0xff]  ;;  %v396_v9 = vld [vmem:[%s4677_s1 + $0x478] sm:$0xff] }
  0x23   : > { %610 = vmatpush.msra.mxu1 %v453_v45  ;;  %650 = vmatpush.msra.mxu3 %v454_v47  ;;  %v2996_v1 = vld.sshfl [vmem:[#allocation1] sm:$0xff pattern:$0x75316420]  ;;  %v2998_v2 = vld.sshfl [vmem:[#allocation1 + $0x8] sm:$0xff pattern:$0x75316420]  ;;  %vm2286_vm11 = vmneg %vm1641_vm10 }
  0x24   : > { %591 = vmatpush.msra.mxu0 %v283_v49  ;;  %631 = vmatpush.msra.mxu2 %v284_v51  ;;  %v556_v10 = vld [vmem:[%s4677_s1 + $0x978] sm:$0xff]  ;;  %v385_v11 = vld [vmem:[%s4677_s1 + $0x420] sm:$0xff]  ;;  %v386_v13 = vld [vmem:[%s4677_s1 + $0x428] sm:$0xff] }
  0x25   : > { %611 = vmatpush.msra.mxu1 %v443_v50  ;;  %651 = vmatpush.msra.mxu3 %v444_v52  ;;  %v545_v12 = vld [vmem:[%s4677_s1 + $0x920] sm:$0xff]  ;;  %v546_v14 = vld [vmem:[%s4677_s1 + $0x928] sm:$0xff]  ;;  %v375_v15 = vld [vmem:[%s4677_s1 + $0x3d0] sm:$0xff] }
  0x26   : > { %592 = vmatpush.msra.mxu0 %v273_v53  ;;  %632 = vmatpush.msra.mxu2 %v274_v55  ;;  %v535_v16 = vld [vmem:[%s4677_s1 + $0x8d0] sm:$0xff]  ;;  %v376_v17 = vld [vmem:[%s4677_s1 + $0x3d8] sm:$0xff]  ;;  %v365_v19 = vld [vmem:[%s4677_s1 + $0x380] sm:$0xff] }
  0x27   : > { %612 = vmatpush.msra.mxu1 %v433_v54  ;;  %652 = vmatpush.msra.mxu3 %v434_v56  ;;  %v536_v18 = vld [vmem:[%s4677_s1 + $0x8d8] sm:$0xff]  ;;  %v525_v20 = vld [vmem:[%s4677_s1 + $0x880] sm:$0xff]  ;;  %v366_v21 = vld [vmem:[%s4677_s1 + $0x388] sm:$0xff] }
  0x28   : > { %593 = vmatpush.msra.mxu0 %v263_v57  ;;  %633 = vmatpush.msra.mxu2 %v264_v59  ;;  %v526_v22 = vld [vmem:[%s4677_s1 + $0x888] sm:$0xff]  ;;  %v355_v23 = vld [vmem:[%s4677_s1 + $0x330] sm:$0xff]  ;;  %v356_v25 = vld [vmem:[%s4677_s1 + $0x338] sm:$0xff] }
  0x29   : > { %613 = vmatpush.msra.mxu1 %v423_v58  ;;  %653 = vmatpush.msra.mxu3 %v424_v60  ;;  %v515_v24 = vld [vmem:[%s4677_s1 + $0x830] sm:$0xff]  ;;  %v516_v26 = vld [vmem:[%s4677_s1 + $0x838] sm:$0xff]  ;;  %v345_v27 = vld [vmem:[%s4677_s1 + $0x2e0] sm:$0xff] }
  0x2a   : > { %594 = vmatpush.msra.mxu0 %v253_v61  ;;  %634 = vmatpush.msra.mxu2 %v254_v63  ;;  %v505_v28 = vld [vmem:[%s4677_s1 + $0x7e0] sm:$0xff]  ;;  %v346_v29 = vld [vmem:[%s4677_s1 + $0x2e8] sm:$0xff]  ;;  %v335_v31 = vld [vmem:[%s4677_s1 + $0x290] sm:$0xff] }
  0x2b   : > { %614 = vmatpush.msra.mxu1 %v413_v62  ;;  %654 = vmatpush.msra.mxu3 %v414_v0  ;;  %v506_v30 = vld [vmem:[%s4677_s1 + $0x7e8] sm:$0xff]  ;;  %v495_v32 = vld [vmem:[%s4677_s1 + $0x790] sm:$0xff]  ;;  %v336_v33 = vld [vmem:[%s4677_s1 + $0x298] sm:$0xff] }
  0x2c   : > { %635 = vmatmul.f32.vlgmr.msra.gmra.mxu2 %v2996_v1  ;;  %655 = vmatmul.f32.vlgmr.msra.gmra.mxu3 %v2998_v2  ;;  %v496_v34 = vld [vmem:[%s4677_s1 + $0x798] sm:$0xff]  ;;  %v325_v35 = vld [vmem:[%s4677_s1 + $0x240] sm:$0xff]  ;;  %v326_v37 = vld [vmem:[%s4677_s1 + $0x248] sm:$0xff] }
  0x2d   : > { %659 = vmatpush.msrb.mxu0 %v405_v3  ;;  %679 = vmatpush.msrb.mxu1 %v565_v4  ;;  %v485_v36 = vld [vmem:[%s4677_s1 + $0x740] sm:$0xff]  ;;  %v486_v38 = vld [vmem:[%s4677_s1 + $0x748] sm:$0xff]  ;;  %v315_v39 = vld [vmem:[%s4677_s1 + $0x1f0] sm:$0xff] }
  0x2e   : > { %699 = vmatpush.msrb.mxu2 %v406_v5  ;;  %719 = vmatpush.msrb.mxu3 %v566_v6  ;;  %v475_v40 = vld [vmem:[%s4677_s1 + $0x6f0] sm:$0xff]  ;;  %v316_v41 = vld [vmem:[%s4677_s1 + $0x1f8] sm:$0xff]  ;;  %v305_v43 = vld [vmem:[%s4677_s1 + $0x1a0] sm:$0xff] }
  0x2f   : > { %660 = vmatpush.msrb.mxu0 %v395_v7  ;;  %680 = vmatpush.msrb.mxu1 %v555_v8  ;;  %v476_v42 = vld [vmem:[%s4677_s1 + $0x6f8] sm:$0xff]  ;;  %v465_v44 = vld [vmem:[%s4677_s1 + $0x6a0] sm:$0xff]  ;;  %v306_v45 = vld [vmem:[%s4677_s1 + $0x1a8] sm:$0xff] }
  0x30   : > { %700 = vmatpush.msrb.mxu2 %v396_v9  ;;  %720 = vmatpush.msrb.mxu3 %v556_v10  ;;  %v466_v46 = vld [vmem:[%s4677_s1 + $0x6a8] sm:$0xff]  ;;  %v295_v47 = vld [vmem:[%s4677_s1 + $0x150] sm:$0xff]  ;;  %v296_v49 = vld [vmem:[%s4677_s1 + $0x158] sm:$0xff] }
  0x31   : > { %661 = vmatpush.msrb.mxu0 %v385_v11  ;;  %681 = vmatpush.msrb.mxu1 %v545_v12  ;;  %v455_v48 = vld [vmem:[%s4677_s1 + $0x650] sm:$0xff]  ;;  %v456_v50 = vld [vmem:[%s4677_s1 + $0x658] sm:$0xff]  ;;  %v285_v51 = vld [vmem:[%s4677_s1 + $0x100] sm:$0xff] }
  0x32   : > { %701 = vmatpush.msrb.mxu2 %v386_v13  ;;  %721 = vmatpush.msrb.mxu3 %v546_v14  ;;  %v445_v52 = vld [vmem:[%s4677_s1 + $0x600] sm:$0xff]  ;;  %v286_v53 = vld [vmem:[%s4677_s1 + $0x108] sm:$0xff]  ;;  %v275_v55 = vld [vmem:[%s4677_s1 + $0xb0] sm:$0xff] }
  0x33   : > { %595 = vmatmul.f32.vlgmr.msra.gmra.mxu0 %v2996_v1  ;;  %615 = vmatmul.f32.vlgmr.msra.gmra.mxu1 %v2998_v2  ;;  %v446_v54 = vld [vmem:[%s4677_s1 + $0x608] sm:$0xff]  ;;  %v435_v56 = vld [vmem:[%s4677_s1 + $0x5b0] sm:$0xff]  ;;  %v276_v57 = vld [vmem:[%s4677_s1 + $0xb8] sm:$0xff] }
  0x34   : > { %662 = vmatpush.msrb.mxu0 %v375_v15  ;;  %682 = vmatpush.msrb.mxu1 %v535_v16  ;;  %v436_v58 = vld [vmem:[%s4677_s1 + $0x5b8] sm:$0xff]  ;;  %v265_v59 = vld [vmem:[%s4677_s1 + $0x60] sm:$0xff]  ;;  %v266_v61 = vld [vmem:[%s4677_s1 + $0x68] sm:$0xff] }
  0x35   : > { %702 = vmatpush.msrb.mxu2 %v376_v17  ;;  %722 = vmatpush.msrb.mxu3 %v536_v18  ;;  %v425_v60 = vld [vmem:[%s4677_s1 + $0x560] sm:$0xff]  ;;  %v426_v62 = vld [vmem:[%s4677_s1 + $0x568] sm:$0xff]  ;;  %v255_v63 = vld [vmem:[%s4677_s1 + $0x10] sm:$0xff] }
  0x36   : > { %663 = vmatpush.msrb.mxu0 %v365_v19  ;;  %683 = vmatpush.msrb.mxu1 %v525_v20  ;;  %v415_v0 = vld [vmem:[%s4677_s1 + $0x510] sm:$0xff]  ;;  %v256_v3 = vld [vmem:[%s4677_s1 + $0x18] sm:$0xff]  ;;  %v397_v9 = vld [vmem:[%s4677_s1 + $0x480] sm:$0xff] }
  0x37   : > { %703 = vmatpush.msrb.mxu2 %v366_v21  ;;  %723 = vmatpush.msrb.mxu3 %v526_v22  ;;  %v416_v4 = vld [vmem:[%s4677_s1 + $0x518] sm:$0xff]  ;;  %v407_v5 = vld [vmem:[%s4677_s1 + $0x4d0] sm:$0xff]  ;;  %v557_v10 = vld [vmem:[%s4677_s1 + $0x980] sm:$0xff] }
  0x38   : > { %664 = vmatpush.msrb.mxu0 %v355_v23  ;;  %684 = vmatpush.msrb.mxu1 %v515_v24  ;;  %v567_v6 = vld [vmem:[%s4677_s1 + $0x9d0] sm:$0xff]  ;;  %v408_v7 = vld [vmem:[%s4677_s1 + $0x4d8] sm:$0xff]  ;;  %v398_v11 = vld [vmem:[%s4677_s1 + $0x488] sm:$0xff] }
  0x39   : > { %704 = vmatpush.msrb.mxu2 %v356_v25  ;;  %724 = vmatpush.msrb.mxu3 %v516_v26  ;;  %v568_v8 = vld [vmem:[%s4677_s1 + $0x9d8] sm:$0xff]  ;;  %v558_v12 = vld [vmem:[%s4677_s1 + $0x988] sm:$0xff]  ;;  %v387_v13 = vld [vmem:[%s4677_s1 + $0x430] sm:$0xff] }
  0x3a   : > { %665 = vmatpush.msrb.mxu0 %v345_v27  ;;  %685 = vmatpush.msrb.mxu1 %v505_v28  ;;  %v547_v14 = vld [vmem:[%s4677_s1 + $0x930] sm:$0xff]  ;;  %v388_v15 = vld [vmem:[%s4677_s1 + $0x438] sm:$0xff]  ;;  %v377_v17 = vld [vmem:[%s4677_s1 + $0x3e0] sm:$0xff] }
  0x3b   : > { %705 = vmatpush.msrb.mxu2 %v346_v29  ;;  %725 = vmatpush.msrb.mxu3 %v506_v30  ;;  %v548_v16 = vld [vmem:[%s4677_s1 + $0x938] sm:$0xff]  ;;  %v537_v18 = vld [vmem:[%s4677_s1 + $0x8e0] sm:$0xff]  ;;  %v378_v19 = vld [vmem:[%s4677_s1 + $0x3e8] sm:$0xff] }
  0x3c   : > { %666 = vmatpush.msrb.mxu0 %v335_v31  ;;  %686 = vmatpush.msrb.mxu1 %v495_v32  ;;  %v538_v20 = vld [vmem:[%s4677_s1 + $0x8e8] sm:$0xff]  ;;  %v367_v21 = vld [vmem:[%s4677_s1 + $0x390] sm:$0xff]  ;;  %v368_v23 = vld [vmem:[%s4677_s1 + $0x398] sm:$0xff] }
  0x3d   : > { %706 = vmatpush.msrb.mxu2 %v336_v33  ;;  %726 = vmatpush.msrb.mxu3 %v496_v34  ;;  %v527_v22 = vld [vmem:[%s4677_s1 + $0x890] sm:$0xff]  ;;  %v528_v24 = vld [vmem:[%s4677_s1 + $0x898] sm:$0xff]  ;;  %v357_v25 = vld [vmem:[%s4677_s1 + $0x340] sm:$0xff] }
  0x3e   : > { %667 = vmatpush.msrb.mxu0 %v325_v35  ;;  %687 = vmatpush.msrb.mxu1 %v485_v36  ;;  %v517_v26 = vld [vmem:[%s4677_s1 + $0x840] sm:$0xff]  ;;  %v358_v27 = vld [vmem:[%s4677_s1 + $0x348] sm:$0xff]  ;;  %v347_v29 = vld [vmem:[%s4677_s1 + $0x2f0] sm:$0xff] }
  0x3f   : > { %707 = vmatpush.msrb.mxu2 %v326_v37  ;;  %727 = vmatpush.msrb.mxu3 %v486_v38  ;;  %v518_v28 = vld [vmem:[%s4677_s1 + $0x848] sm:$0xff]  ;;  %v507_v30 = vld [vmem:[%s4677_s1 + $0x7f0] sm:$0xff]  ;;  %v348_v31 = vld [vmem:[%s4677_s1 + $0x2f8] sm:$0xff] }
  0x40   : > { %668 = vmatpush.msrb.mxu0 %v315_v39  ;;  %688 = vmatpush.msrb.mxu1 %v475_v40  ;;  %v508_v32 = vld [vmem:[%s4677_s1 + $0x7f8] sm:$0xff]  ;;  %v337_v33 = vld [vmem:[%s4677_s1 + $0x2a0] sm:$0xff]  ;;  %v338_v35 = vld [vmem:[%s4677_s1 + $0x2a8] sm:$0xff] }
  0x41   : > { %708 = vmatpush.msrb.mxu2 %v316_v41  ;;  %728 = vmatpush.msrb.mxu3 %v476_v42  ;;  %v497_v34 = vld [vmem:[%s4677_s1 + $0x7a0] sm:$0xff]  ;;  %v498_v36 = vld [vmem:[%s4677_s1 + $0x7a8] sm:$0xff]  ;;  %v327_v37 = vld [vmem:[%s4677_s1 + $0x250] sm:$0xff] }
  0x42   : > { %669 = vmatpush.msrb.mxu0 %v305_v43  ;;  %689 = vmatpush.msrb.mxu1 %v465_v44  ;;  %v487_v38 = vld [vmem:[%s4677_s1 + $0x750] sm:$0xff]  ;;  %v328_v39 = vld [vmem:[%s4677_s1 + $0x258] sm:$0xff]  ;;  %v317_v41 = vld [vmem:[%s4677_s1 + $0x200] sm:$0xff] }
  0x43   : > { %709 = vmatpush.msrb.mxu2 %v306_v45  ;;  %729 = vmatpush.msrb.mxu3 %v466_v46  ;;  %v488_v40 = vld [vmem:[%s4677_s1 + $0x758] sm:$0xff]  ;;  %v477_v42 = vld [vmem:[%s4677_s1 + $0x700] sm:$0xff]  ;;  %v318_v43 = vld [vmem:[%s4677_s1 + $0x208] sm:$0xff] }
  0x44   : > { %670 = vmatpush.msrb.mxu0 %v295_v47  ;;  %690 = vmatpush.msrb.mxu1 %v455_v48  ;;  %v478_v44 = vld [vmem:[%s4677_s1 + $0x708] sm:$0xff]  ;;  %v307_v45 = vld [vmem:[%s4677_s1 + $0x1b0] sm:$0xff]  ;;  %v308_v47 = vld [vmem:[%s4677_s1 + $0x1b8] sm:$0xff] }
  0x45   : > { %710 = vmatpush.msrb.mxu2 %v296_v49  ;;  %730 = vmatpush.msrb.mxu3 %v456_v50  ;;  %v467_v46 = vld [vmem:[%s4677_s1 + $0x6b0] sm:$0xff]  ;;  %v468_v48 = vld [vmem:[%s4677_s1 + $0x6b8] sm:$0xff]  ;;  %v297_v49 = vld [vmem:[%s4677_s1 + $0x160] sm:$0xff] }
  0x46   : > { %671 = vmatpush.msrb.mxu0 %v285_v51  ;;  %691 = vmatpush.msrb.mxu1 %v445_v52  ;;  %v457_v50 = vld [vmem:[%s4677_s1 + $0x660] sm:$0xff]  ;;  %v298_v51 = vld [vmem:[%s4677_s1 + $0x168] sm:$0xff] }
  0x47   : > { %711 = vmatpush.msrb.mxu2 %v286_v53  ;;  %731 = vmatpush.msrb.mxu3 %v446_v54  ;;  %v458_v52 = vld [vmem:[%s4677_s1 + $0x668] sm:$0xff]  ;;  %v287_v53 = vld [vmem:[%s4677_s1 + $0x110] sm:$0xff] }
  0x48   : > { %672 = vmatpush.msrb.mxu0 %v275_v55  ;;  %692 = vmatpush.msrb.mxu1 %v435_v56  ;;  %v447_v54 = vld [vmem:[%s4677_s1 + $0x610] sm:$0xff]  ;;  %v288_v55 = vld [vmem:[%s4677_s1 + $0x118] sm:$0xff] }
  0x49   : > { %712 = vmatpush.msrb.mxu2 %v276_v57  ;;  %732 = vmatpush.msrb.mxu3 %v436_v58  ;;  %v448_v56 = vld [vmem:[%s4677_s1 + $0x618] sm:$0xff]  ;;  %v277_v57 = vld [vmem:[%s4677_s1 + $0xc0] sm:$0xff] }
  0x4a   : > { %673 = vmatpush.msrb.mxu0 %v265_v59  ;;  %693 = vmatpush.msrb.mxu1 %v425_v60  ;;  %v437_v58 = vld [vmem:[%s4677_s1 + $0x5c0] sm:$0xff]  ;;  %v278_v59 = vld [vmem:[%s4677_s1 + $0xc8] sm:$0xff] }
  0x4b   : > { %713 = vmatpush.msrb.mxu2 %v266_v61  ;;  %733 = vmatpush.msrb.mxu3 %v426_v62  ;;  %v438_v60 = vld [vmem:[%s4677_s1 + $0x5c8] sm:$0xff]  ;;  %v267_v61 = vld [vmem:[%s4677_s1 + $0x70] sm:$0xff] }
  0x4c   : > { %674 = vmatpush.msrb.mxu0 %v255_v63  ;;  %694 = vmatpush.msrb.mxu1 %v415_v0  ;;  %v427_v62 = vld [vmem:[%s4677_s1 + $0x570] sm:$0xff]  ;;  %v268_v63 = vld [vmem:[%s4677_s1 + $0x78] sm:$0xff] }
  0x4d   : > { %714 = vmatpush.msrb.mxu2 %v256_v3  ;;  %734 = vmatpush.msrb.mxu3 %v416_v4  ;;  %v428_v0 = vld [vmem:[%s4677_s1 + $0x578] sm:$0xff]  ;;  %v257_v3 = vld [vmem:[%s4677_s1 + $0x20] sm:$0xff] }
  0x4e   : > { %675 = vmatmul.f32.vlgmr.msrb.gmra.mxu0 %v2996_v1  ;;  %695 = vmatmul.f32.vlgmr.msrb.gmra.mxu1 %v2998_v2  ;;  %v417_v4 = vld [vmem:[%s4677_s1 + $0x520] sm:$0xff] }
  0x4f   : > { %739 = vmatpush.msra.mxu0 %v407_v5  ;;  %759 = vmatpush.msra.mxu1 %v567_v6  ;;  %v258_v5 = vld [vmem:[%s4677_s1 + $0x28] sm:$0xff] }
  0x50   : > { %779 = vmatpush.msra.mxu2 %v408_v7  ;;  %799 = vmatpush.msra.mxu3 %v568_v8  ;;  %v418_v6 = vld [vmem:[%s4677_s1 + $0x528] sm:$0xff]  ;;  %v409_v7 = vld [vmem:[%s4677_s1 + $0x4e0] sm:$0xff] }
  0x51   : > { %715 = vmatmul.f32.vlgmr.msrb.gmra.mxu2 %v2996_v1  ;;  %735 = vmatmul.f32.vlgmr.msrb.gmra.mxu3 %v2998_v2  ;;  %v569_v8 = vld [vmem:[%s4677_s1 + $0x9e0] sm:$0xff] }
  0x52   : > { %740 = vmatpush.msra.mxu0 %v397_v9  ;;  %760 = vmatpush.msra.mxu1 %v557_v10  ;;  %v410_v9 = vld [vmem:[%s4677_s1 + $0x4e8] sm:$0xff] }
  0x53   : > { %780 = vmatpush.msra.mxu2 %v398_v11  ;;  %800 = vmatpush.msra.mxu3 %v558_v12  ;;  %v570_v10 = vld [vmem:[%s4677_s1 + $0x9e8] sm:$0xff]  ;;  %v399_v11 = vld [vmem:[%s4677_s1 + $0x490] sm:$0xff] }
  0x54   : > { %741 = vmatpush.msra.mxu0 %v387_v13  ;;  %761 = vmatpush.msra.mxu1 %v547_v14  ;;  %v559_v12 = vld [vmem:[%s4677_s1 + $0x990] sm:$0xff]  ;;  %v400_v13 = vld [vmem:[%s4677_s1 + $0x498] sm:$0xff] }
  0x55   : > { %781 = vmatpush.msra.mxu2 %v388_v15  ;;  %801 = vmatpush.msra.mxu3 %v548_v16  ;;  %v560_v14 = vld [vmem:[%s4677_s1 + $0x998] sm:$0xff]  ;;  %v389_v15 = vld [vmem:[%s4677_s1 + $0x440] sm:$0xff] }
  0x56   : > { %742 = vmatpush.msra.mxu0 %v377_v17  ;;  %762 = vmatpush.msra.mxu1 %v537_v18  ;;  %v549_v16 = vld [vmem:[%s4677_s1 + $0x940] sm:$0xff]  ;;  %v390_v17 = vld [vmem:[%s4677_s1 + $0x448] sm:$0xff] }
  0x57   : > { %782 = vmatpush.msra.mxu2 %v378_v19  ;;  %802 = vmatpush.msra.mxu3 %v538_v20  ;;  %v550_v18 = vld [vmem:[%s4677_s1 + $0x948] sm:$0xff]  ;;  %v379_v19 = vld [vmem:[%s4677_s1 + $0x3f0] sm:$0xff] }
  0x58   : > { %743 = vmatpush.msra.mxu0 %v367_v21  ;;  %763 = vmatpush.msra.mxu1 %v527_v22  ;;  %v539_v20 = vld [vmem:[%s4677_s1 + $0x8f0] sm:$0xff]  ;;  %v380_v21 = vld [vmem:[%s4677_s1 + $0x3f8] sm:$0xff] }
  0x59   : > { %783 = vmatpush.msra.mxu2 %v368_v23  ;;  %803 = vmatpush.msra.mxu3 %v528_v24  ;;  %v540_v22 = vld [vmem:[%s4677_s1 + $0x8f8] sm:$0xff]  ;;  %v369_v23 = vld [vmem:[%s4677_s1 + $0x3a0] sm:$0xff] }
  0x5a   : > { %744 = vmatpush.msra.mxu0 %v357_v25  ;;  %764 = vmatpush.msra.mxu1 %v517_v26  ;;  %v529_v24 = vld [vmem:[%s4677_s1 + $0x8a0] sm:$0xff]  ;;  %v370_v25 = vld [vmem:[%s4677_s1 + $0x3a8] sm:$0xff] }
  0x5b   : > { %784 = vmatpush.msra.mxu2 %v358_v27  ;;  %804 = vmatpush.msra.mxu3 %v518_v28  ;;  %v530_v26 = vld [vmem:[%s4677_s1 + $0x8a8] sm:$0xff]  ;;  %v359_v27 = vld [vmem:[%s4677_s1 + $0x350] sm:$0xff] }
  0x5c   : > { %745 = vmatpush.msra.mxu0 %v347_v29  ;;  %765 = vmatpush.msra.mxu1 %v507_v30  ;;  %v519_v28 = vld [vmem:[%s4677_s1 + $0x850] sm:$0xff]  ;;  %v360_v29 = vld [vmem:[%s4677_s1 + $0x358] sm:$0xff] }
  0x5d   : > { %785 = vmatpush.msra.mxu2 %v348_v31  ;;  %805 = vmatpush.msra.mxu3 %v508_v32  ;;  %v520_v30 = vld [vmem:[%s4677_s1 + $0x858] sm:$0xff]  ;;  %v349_v31 = vld [vmem:[%s4677_s1 + $0x300] sm:$0xff] }
  0x5e   : > { %746 = vmatpush.msra.mxu0 %v337_v33  ;;  %766 = vmatpush.msra.mxu1 %v497_v34  ;;  %v509_v32 = vld [vmem:[%s4677_s1 + $0x800] sm:$0xff]  ;;  %v350_v33 = vld [vmem:[%s4677_s1 + $0x308] sm:$0xff] }
  0x5f   : > { %786 = vmatpush.msra.mxu2 %v338_v35  ;;  %806 = vmatpush.msra.mxu3 %v498_v36  ;;  %v510_v34 = vld [vmem:[%s4677_s1 + $0x808] sm:$0xff]  ;;  %v339_v35 = vld [vmem:[%s4677_s1 + $0x2b0] sm:$0xff] }
  0x60   : > { %747 = vmatpush.msra.mxu0 %v327_v37  ;;  %767 = vmatpush.msra.mxu1 %v487_v38  ;;  %v499_v36 = vld [vmem:[%s4677_s1 + $0x7b0] sm:$0xff]  ;;  %v340_v37 = vld [vmem:[%s4677_s1 + $0x2b8] sm:$0xff] }
  0x61   : > { %787 = vmatpush.msra.mxu2 %v328_v39  ;;  %807 = vmatpush.msra.mxu3 %v488_v40  ;;  %v500_v38 = vld [vmem:[%s4677_s1 + $0x7b8] sm:$0xff]  ;;  %v329_v39 = vld [vmem:[%s4677_s1 + $0x260] sm:$0xff] }
  0x62   : > { %748 = vmatpush.msra.mxu0 %v317_v41  ;;  %768 = vmatpush.msra.mxu1 %v477_v42  ;;  %v489_v40 = vld [vmem:[%s4677_s1 + $0x760] sm:$0xff]  ;;  %v330_v41 = vld [vmem:[%s4677_s1 + $0x268] sm:$0xff] }
  0x63   : > { %788 = vmatpush.msra.mxu2 %v318_v43  ;;  %808 = vmatpush.msra.mxu3 %v478_v44  ;;  %v490_v42 = vld [vmem:[%s4677_s1 + $0x768] sm:$0xff]  ;;  %v319_v43 = vld [vmem:[%s4677_s1 + $0x210] sm:$0xff] }
  0x64   : > { %749 = vmatpush.msra.mxu0 %v307_v45  ;;  %769 = vmatpush.msra.mxu1 %v467_v46  ;;  %v479_v44 = vld [vmem:[%s4677_s1 + $0x710] sm:$0xff]  ;;  %v320_v45 = vld [vmem:[%s4677_s1 + $0x218] sm:$0xff] }
  0x65   : > { %789 = vmatpush.msra.mxu2 %v308_v47  ;;  %809 = vmatpush.msra.mxu3 %v468_v48  ;;  %v480_v46 = vld [vmem:[%s4677_s1 + $0x718] sm:$0xff]  ;;  %v309_v47 = vld [vmem:[%s4677_s1 + $0x1c0] sm:$0xff] }
  0x66   : > { %750 = vmatpush.msra.mxu0 %v297_v49  ;;  %770 = vmatpush.msra.mxu1 %v457_v50  ;;  %v469_v48 = vld [vmem:[%s4677_s1 + $0x6c0] sm:$0xff]  ;;  %v310_v49 = vld [vmem:[%s4677_s1 + $0x1c8] sm:$0xff] }
  0x67   : > { %790 = vmatpush.msra.mxu2 %v298_v51  ;;  %810 = vmatpush.msra.mxu3 %v458_v52  ;;  %v470_v50 = vld [vmem:[%s4677_s1 + $0x6c8] sm:$0xff]  ;;  %v299_v51 = vld [vmem:[%s4677_s1 + $0x170] sm:$0xff] }
  0x68   : > { %751 = vmatpush.msra.mxu0 %v287_v53  ;;  %771 = vmatpush.msra.mxu1 %v447_v54  ;;  %v459_v52 = vld [vmem:[%s4677_s1 + $0x670] sm:$0xff]  ;;  %v300_v53 = vld [vmem:[%s4677_s1 + $0x178] sm:$0xff] }
  0x69   : > { %791 = vmatpush.msra.mxu2 %v288_v55  ;;  %811 = vmatpush.msra.mxu3 %v448_v56  ;;  %v460_v54 = vld [vmem:[%s4677_s1 + $0x678] sm:$0xff]  ;;  %v289_v55 = vld [vmem:[%s4677_s1 + $0x120] sm:$0xff] }
  0x6a   : > { %752 = vmatpush.msra.mxu0 %v277_v57  ;;  %772 = vmatpush.msra.mxu1 %v437_v58  ;;  %v449_v56 = vld [vmem:[%s4677_s1 + $0x620] sm:$0xff]  ;;  %v290_v57 = vld [vmem:[%s4677_s1 + $0x128] sm:$0xff] }
  0x6b   : > { %792 = vmatpush.msra.mxu2 %v278_v59  ;;  %812 = vmatpush.msra.mxu3 %v438_v60  ;;  %v450_v58 = vld [vmem:[%s4677_s1 + $0x628] sm:$0xff]  ;;  %v279_v59 = vld [vmem:[%s4677_s1 + $0xd0] sm:$0xff] }
  0x6c   : > { %753 = vmatpush.msra.mxu0 %v267_v61  ;;  %773 = vmatpush.msra.mxu1 %v427_v62  ;;  %v439_v60 = vld [vmem:[%s4677_s1 + $0x5d0] sm:$0xff]  ;;  %v280_v61 = vld [vmem:[%s4677_s1 + $0xd8] sm:$0xff] }
  0x6d   : > { %793 = vmatpush.msra.mxu2 %v268_v63  ;;  %813 = vmatpush.msra.mxu3 %v428_v0  ;;  %v440_v62 = vld [vmem:[%s4677_s1 + $0x5d8] sm:$0xff]  ;;  %v269_v63 = vld [vmem:[%s4677_s1 + $0x80] sm:$0xff] }
  0x6e   : > { %754 = vmatpush.msra.mxu0 %v257_v3  ;;  %774 = vmatpush.msra.mxu1 %v417_v4  ;;  %v429_v0 = vld [vmem:[%s4677_s1 + $0x580] sm:$0xff]  ;;  %v270_v3 = vld [vmem:[%s4677_s1 + $0x88] sm:$0xff] }
  0x6f   : > { %794 = vmatpush.msra.mxu2 %v258_v5  ;;  %814 = vmatpush.msra.mxu3 %v418_v6  ;;  %v430_v4 = vld [vmem:[%s4677_s1 + $0x588] sm:$0xff]  ;;  %v259_v5 = vld [vmem:[%s4677_s1 + $0x30] sm:$0xff] }
  0x70   : > { %755 = vmatmul.f32.vlgmr.msra.gmra.mxu0 %v2996_v1  ;;  %775 = vmatmul.f32.vlgmr.msra.gmra.mxu1 %v2998_v2  ;;  %v419_v6 = vld [vmem:[%s4677_s1 + $0x530] sm:$0xff] }
  0x71   : > { %795 = vmatmul.f32.vlgmr.msra.gmra.mxu2 %v2996_v1  ;;  %815 = vmatmul.f32.vlgmr.msra.gmra.mxu3 %v2998_v2 }
  0x72   : > { %819 = vmatpush.msrb.mxu0 %v409_v7  ;;  %839 = vmatpush.msrb.mxu1 %v569_v8  ;;  %v260_v7 = vld [vmem:[%s4677_s1 + $0x38] sm:$0xff] }
  0x73   : > { %859 = vmatpush.msrb.mxu2 %v410_v9  ;;  %879 = vmatpush.msrb.mxu3 %v570_v10  ;;  %v420_v8 = vld [vmem:[%s4677_s1 + $0x538] sm:$0xff]  ;;  %v411_v9 = vld [vmem:[%s4677_s1 + $0x4f0] sm:$0xff] }
  0x74   : > { %820 = vmatpush.msrb.mxu0 %v399_v11  ;;  %840 = vmatpush.msrb.mxu1 %v559_v12  ;;  %v571_v10 = vld [vmem:[%s4677_s1 + $0x9f0] sm:$0xff]  ;;  %v412_v11 = vld [vmem:[%s4677_s1 + $0x4f8] sm:$0xff] }
  0x75   : > { %860 = vmatpush.msrb.mxu2 %v400_v13  ;;  %880 = vmatpush.msrb.mxu3 %v560_v14  ;;  %v572_v12 = vld [vmem:[%s4677_s1 + $0x9f8] sm:$0xff]  ;;  %v401_v13 = vld [vmem:[%s4677_s1 + $0x4a0] sm:$0xff] }
  0x76   : > { %821 = vmatpush.msrb.mxu0 %v389_v15  ;;  %841 = vmatpush.msrb.mxu1 %v549_v16  ;;  %v561_v14 = vld [vmem:[%s4677_s1 + $0x9a0] sm:$0xff]  ;;  %v402_v15 = vld [vmem:[%s4677_s1 + $0x4a8] sm:$0xff]  ;;  %v551_v16 = vld [vmem:[%s4677_s1 + $0x950] sm:$0xff] }
  0x77   : > { %861 = vmatpush.msrb.mxu2 %v390_v17  ;;  %881 = vmatpush.msrb.mxu3 %v550_v18  ;;  %v392_v17 = vld [vmem:[%s4677_s1 + $0x458] sm:$0xff] }
  0x78   : > { %822 = vmatpush.msrb.mxu0 %v379_v19  ;;  %842 = vmatpush.msrb.mxu1 %v539_v20  ;;  %v552_v18 = vld [vmem:[%s4677_s1 + $0x958] sm:$0xff]  ;;  %v381_v19 = vld [vmem:[%s4677_s1 + $0x400] sm:$0xff] }
  0x79   : > { %862 = vmatpush.msrb.mxu2 %v380_v21  ;;  %882 = vmatpush.msrb.mxu3 %v540_v22  ;;  %v541_v20 = vld [vmem:[%s4677_s1 + $0x900] sm:$0xff]  ;;  %v382_v21 = vld [vmem:[%s4677_s1 + $0x408] sm:$0xff] }
  0x7a   : > { %823 = vmatpush.msrb.mxu0 %v369_v23  ;;  %843 = vmatpush.msrb.mxu1 %v529_v24  ;;  %v542_v22 = vld [vmem:[%s4677_s1 + $0x908] sm:$0xff]  ;;  %v371_v23 = vld [vmem:[%s4677_s1 + $0x3b0] sm:$0xff] }
  0x7b   : > { %863 = vmatpush.msrb.mxu2 %v370_v25  ;;  %883 = vmatpush.msrb.mxu3 %v530_v26  ;;  %v531_v24 = vld [vmem:[%s4677_s1 + $0x8b0] sm:$0xff]  ;;  %v372_v25 = vld [vmem:[%s4677_s1 + $0x3b8] sm:$0xff] }
  0x7c   : > { %824 = vmatpush.msrb.mxu0 %v359_v27  ;;  %844 = vmatpush.msrb.mxu1 %v519_v28  ;;  %v532_v26 = vld [vmem:[%s4677_s1 + $0x8b8] sm:$0xff]  ;;  %v361_v27 = vld [vmem:[%s4677_s1 + $0x360] sm:$0xff] }
  0x7d   : > { %864 = vmatpush.msrb.mxu2 %v360_v29  ;;  %884 = vmatpush.msrb.mxu3 %v520_v30  ;;  %v521_v28 = vld [vmem:[%s4677_s1 + $0x860] sm:$0xff]  ;;  %v362_v29 = vld [vmem:[%s4677_s1 + $0x368] sm:$0xff] }
  0x7e   : > { %825 = vmatpush.msrb.mxu0 %v349_v31  ;;  %845 = vmatpush.msrb.mxu1 %v509_v32  ;;  %v522_v30 = vld [vmem:[%s4677_s1 + $0x868] sm:$0xff]  ;;  %v351_v31 = vld [vmem:[%s4677_s1 + $0x310] sm:$0xff] }
  0x7f   : > { %865 = vmatpush.msrb.mxu2 %v350_v33  ;;  %885 = vmatpush.msrb.mxu3 %v510_v34  ;;  %v511_v32 = vld [vmem:[%s4677_s1 + $0x810] sm:$0xff]  ;;  %v352_v33 = vld [vmem:[%s4677_s1 + $0x318] sm:$0xff] }
  0x80   : > { %826 = vmatpush.msrb.mxu0 %v339_v35  ;;  %846 = vmatpush.msrb.mxu1 %v499_v36  ;;  %v512_v34 = vld [vmem:[%s4677_s1 + $0x818] sm:$0xff]  ;;  %v341_v35 = vld [vmem:[%s4677_s1 + $0x2c0] sm:$0xff] }
  0x81   : > { %866 = vmatpush.msrb.mxu2 %v340_v37  ;;  %886 = vmatpush.msrb.mxu3 %v500_v38  ;;  %v501_v36 = vld [vmem:[%s4677_s1 + $0x7c0] sm:$0xff]  ;;  %v342_v37 = vld [vmem:[%s4677_s1 + $0x2c8] sm:$0xff] }
  0x82   : > { %827 = vmatpush.msrb.mxu0 %v329_v39  ;;  %847 = vmatpush.msrb.mxu1 %v489_v40  ;;  %v502_v38 = vld [vmem:[%s4677_s1 + $0x7c8] sm:$0xff]  ;;  %v331_v39 = vld [vmem:[%s4677_s1 + $0x270] sm:$0xff] }
  0x83   : > { %867 = vmatpush.msrb.mxu2 %v330_v41  ;;  %887 = vmatpush.msrb.mxu3 %v490_v42  ;;  %v491_v40 = vld [vmem:[%s4677_s1 + $0x770] sm:$0xff]  ;;  %v332_v41 = vld [vmem:[%s4677_s1 + $0x278] sm:$0xff] }
  0x84   : > { %828 = vmatpush.msrb.mxu0 %v319_v43  ;;  %848 = vmatpush.msrb.mxu1 %v479_v44  ;;  %v492_v42 = vld [vmem:[%s4677_s1 + $0x778] sm:$0xff]  ;;  %v321_v43 = vld [vmem:[%s4677_s1 + $0x220] sm:$0xff] }
  0x85   : > { %868 = vmatpush.msrb.mxu2 %v320_v45  ;;  %888 = vmatpush.msrb.mxu3 %v480_v46  ;;  %v481_v44 = vld [vmem:[%s4677_s1 + $0x720] sm:$0xff]  ;;  %v322_v45 = vld [vmem:[%s4677_s1 + $0x228] sm:$0xff] }
  0x86   : > { %829 = vmatpush.msrb.mxu0 %v309_v47  ;;  %849 = vmatpush.msrb.mxu1 %v469_v48  ;;  %v482_v46 = vld [vmem:[%s4677_s1 + $0x728] sm:$0xff]  ;;  %v311_v47 = vld [vmem:[%s4677_s1 + $0x1d0] sm:$0xff] }
  0x87   : > { %869 = vmatpush.msrb.mxu2 %v310_v49  ;;  %889 = vmatpush.msrb.mxu3 %v470_v50  ;;  %v471_v48 = vld [vmem:[%s4677_s1 + $0x6d0] sm:$0xff]  ;;  %v312_v49 = vld [vmem:[%s4677_s1 + $0x1d8] sm:$0xff] }
  0x88   : > { %830 = vmatpush.msrb.mxu0 %v299_v51  ;;  %850 = vmatpush.msrb.mxu1 %v459_v52  ;;  %v472_v50 = vld [vmem:[%s4677_s1 + $0x6d8] sm:$0xff]  ;;  %v301_v51 = vld [vmem:[%s4677_s1 + $0x180] sm:$0xff] }
  0x89   : > { %870 = vmatpush.msrb.mxu2 %v300_v53  ;;  %890 = vmatpush.msrb.mxu3 %v460_v54  ;;  %v461_v52 = vld [vmem:[%s4677_s1 + $0x680] sm:$0xff]  ;;  %v302_v53 = vld [vmem:[%s4677_s1 + $0x188] sm:$0xff] }
  0x8a   : > { %831 = vmatpush.msrb.mxu0 %v289_v55  ;;  %851 = vmatpush.msrb.mxu1 %v449_v56  ;;  %v462_v54 = vld [vmem:[%s4677_s1 + $0x688] sm:$0xff]  ;;  %v291_v55 = vld [vmem:[%s4677_s1 + $0x130] sm:$0xff] }
  0x8b   : > { %871 = vmatpush.msrb.mxu2 %v290_v57  ;;  %891 = vmatpush.msrb.mxu3 %v450_v58  ;;  %v451_v56 = vld [vmem:[%s4677_s1 + $0x630] sm:$0xff]  ;;  %v292_v57 = vld [vmem:[%s4677_s1 + $0x138] sm:$0xff] }
  0x8c   : > { %832 = vmatpush.msrb.mxu0 %v279_v59  ;;  %852 = vmatpush.msrb.mxu1 %v439_v60  ;;  %v452_v58 = vld [vmem:[%s4677_s1 + $0x638] sm:$0xff]  ;;  %v281_v59 = vld [vmem:[%s4677_s1 + $0xe0] sm:$0xff] }
  0x8d   : > { %872 = vmatpush.msrb.mxu2 %v280_v61  ;;  %892 = vmatpush.msrb.mxu3 %v440_v62  ;;  %v441_v60 = vld [vmem:[%s4677_s1 + $0x5e0] sm:$0xff]  ;;  %v282_v61 = vld [vmem:[%s4677_s1 + $0xe8] sm:$0xff] }
  0x8e   : > { %833 = vmatpush.msrb.mxu0 %v269_v63  ;;  %853 = vmatpush.msrb.mxu1 %v429_v0  ;;  %v442_v62 = vld [vmem:[%s4677_s1 + $0x5e8] sm:$0xff]  ;;  %v271_v63 = vld [vmem:[%s4677_s1 + $0x90] sm:$0xff] }
  0x8f   : > { %873 = vmatpush.msrb.mxu2 %v270_v3  ;;  %893 = vmatpush.msrb.mxu3 %v430_v4  ;;  %v431_v0 = vld [vmem:[%s4677_s1 + $0x590] sm:$0xff]  ;;  %v272_v3 = vld [vmem:[%s4677_s1 + $0x98] sm:$0xff] }
  0x90   : > { %834 = vmatpush.msrb.mxu0 %v259_v5  ;;  %854 = vmatpush.msrb.mxu1 %v419_v6  ;;  %v432_v4 = vld [vmem:[%s4677_s1 + $0x598] sm:$0xff]  ;;  %v261_v5 = vld [vmem:[%s4677_s1 + $0x40] sm:$0xff] }
  0x91   : > { %874 = vmatpush.msrb.mxu2 %v260_v7  ;;  %894 = vmatpush.msrb.mxu3 %v420_v8  ;;  %v421_v6 = vld [vmem:[%s4677_s1 + $0x540] sm:$0xff] }
  0x92   : > { %835 = vmatmul.f32.vlgmr.msrb.gmra.mxu0 %v2996_v1  ;;  %855 = vmatmul.f32.vlgmr.msrb.gmra.mxu1 %v2998_v2 }
  0x93   : > { %875 = vmatmul.f32.vlgmr.msrb.gmra.mxu2 %v2996_v1  ;;  %895 = vmatmul.f32.vlgmr.msrb.gmra.mxu3 %v2998_v2  ;;  %v562_v1 = vld [vmem:[%s4677_s1 + $0x9a8] sm:$0xff]  ;;  %v391_v2 = vld [vmem:[%s4677_s1 + $0x450] sm:$0xff] }
  0x94   : > { %899 = vmatpush.msra.mxu0 %v411_v9  ;;  %919 = vmatpush.msra.mxu1 %v571_v10  ;;  %v262_v9 = vld [vmem:[%s4677_s1 + $0x48] sm:$0xff] }
  0x95   : > { %939 = vmatpush.msra.mxu2 %v412_v11  ;;  %959 = vmatpush.msra.mxu3 %v572_v12  ;;  %v422_v10 = vld [vmem:[%s4677_s1 + $0x548] sm:$0xff] }
  0x96   : > { %900 = vmatpush.msra.mxu0 %v401_v13  ;;  %920 = vmatpush.msra.mxu1 %v561_v14 }
  0x97   : > { %940 = vmatpush.msra.mxu2 %v402_v15  ;;  %960 = vmatpush.msra.mxu3 %v562_v1 }
  0x98   : > { %901 = vmatpush.msra.mxu0 %v391_v2  ;;  %921 = vmatpush.msra.mxu1 %v551_v16  ;;  %v2723_v16 = vld.sshfl [vmem:[#allocation1] sm:$0xff pattern:$0x75316420] }
  0x99   : > { %941 = vmatpush.msra.mxu2 %v392_v17  ;;  %961 = vmatpush.msra.mxu3 %v552_v18  ;;  %v2724_v17 = vld.sshfl [vmem:[#allocation1 + $0x8] sm:$0xff pattern:$0x75316420] }
  0x9a   : > { %902 = vmatpush.msra.mxu0 %v381_v19  ;;  %922 = vmatpush.msra.mxu1 %v541_v20 }
  0x9b   : > { %942 = vmatpush.msra.mxu2 %v382_v21  ;;  %962 = vmatpush.msra.mxu3 %v542_v22 }
  0x9c   : > { %903 = vmatpush.msra.mxu0 %v371_v23  ;;  %923 = vmatpush.msra.mxu1 %v531_v24 }
  0x9d   : > { %943 = vmatpush.msra.mxu2 %v372_v25  ;;  %963 = vmatpush.msra.mxu3 %v532_v26 }
  0x9e   : > { %904 = vmatpush.msra.mxu0 %v361_v27  ;;  %924 = vmatpush.msra.mxu1 %v521_v28 }
  0x9f   : > { %944 = vmatpush.msra.mxu2 %v362_v29  ;;  %964 = vmatpush.msra.mxu3 %v522_v30 }
  0xa0   : > { %905 = vmatpush.msra.mxu0 %v351_v31  ;;  %925 = vmatpush.msra.mxu1 %v511_v32 }
  0xa1   : > { %945 = vmatpush.msra.mxu2 %v352_v33  ;;  %965 = vmatpush.msra.mxu3 %v512_v34 }
  0xa2   : > { %906 = vmatpush.msra.mxu0 %v341_v35  ;;  %926 = vmatpush.msra.mxu1 %v501_v36 }
  0xa3   : > { %946 = vmatpush.msra.mxu2 %v342_v37  ;;  %966 = vmatpush.msra.mxu3 %v502_v38 }
  0xa4   : > { %907 = vmatpush.msra.mxu0 %v331_v39  ;;  %927 = vmatpush.msra.mxu1 %v491_v40 }
  0xa5   : > { %947 = vmatpush.msra.mxu2 %v332_v41  ;;  %967 = vmatpush.msra.mxu3 %v492_v42 }
  0xa6   : > { %908 = vmatpush.msra.mxu0 %v321_v43  ;;  %928 = vmatpush.msra.mxu1 %v481_v44 }
  0xa7   : > { %948 = vmatpush.msra.mxu2 %v322_v45  ;;  %968 = vmatpush.msra.mxu3 %v482_v46 }
  0xa8   : > { %909 = vmatpush.msra.mxu0 %v311_v47  ;;  %929 = vmatpush.msra.mxu1 %v471_v48 }
  0xa9   : > { %949 = vmatpush.msra.mxu2 %v312_v49  ;;  %969 = vmatpush.msra.mxu3 %v472_v50 }
  0xaa   : > { %910 = vmatpush.msra.mxu0 %v301_v51  ;;  %930 = vmatpush.msra.mxu1 %v461_v52 }
  0xab   : > { %950 = vmatpush.msra.mxu2 %v302_v53  ;;  %970 = vmatpush.msra.mxu3 %v462_v54 }
  0xac   : > { %911 = vmatpush.msra.mxu0 %v291_v55  ;;  %931 = vmatpush.msra.mxu1 %v451_v56 }
  0xad   : > { %951 = vmatpush.msra.mxu2 %v292_v57  ;;  %971 = vmatpush.msra.mxu3 %v452_v58 }
  0xae   : > { %912 = vmatpush.msra.mxu0 %v281_v59  ;;  %932 = vmatpush.msra.mxu1 %v441_v60 }
  0xaf   : > { %952 = vmatpush.msra.mxu2 %v282_v61  ;;  %972 = vmatpush.msra.mxu3 %v442_v62  ;;  %v636_v7 = vpop.f32.mrf.mxu2  ;;  %v656_v8 = vpop.f32.mrf.mxu3 }
  0xb0   : > { %913 = vmatpush.msra.mxu0 %v271_v63  ;;  %933 = vmatpush.msra.mxu1 %v431_v0  ;;  %v596_v11 = vpop.f32.mrf.mxu0  ;;  %v616_v12 = vpop.f32.mrf.mxu1  ;;  %v3784_v13 = vadd.f32 %v656_v8, %v636_v7 }
  0xb1   : > { %953 = vmatpush.msra.mxu2 %v272_v3  ;;  %973 = vmatpush.msra.mxu3 %v432_v4  ;;  %v3786_v14 = vadd.f32 %v616_v12, %v596_v11 }
  0xb2   : > { %914 = vmatpush.msra.mxu0 %v261_v5  ;;  %934 = vmatpush.msra.mxu1 %v421_v6  ;;  %v992_v15 = vrot.slane %v3784_v13, 4 }
  0xb3   : > { %954 = vmatpush.msra.mxu2 %v262_v9  ;;  %974 = vmatpush.msra.mxu3 %v422_v10  ;;  %v2326_v1 = vpack.i.bf16 %v3784_v13, %v3786_v14  ;;  %v991_v2 = vrot.slane %v3786_v14, 4 }
  0xb4   : > { %915 = vmatmul.f32.vlgmr.msra.gmra.mxu0 %v2723_v16  ;;  %935 = vmatmul.f32.vlgmr.msra.gmra.mxu1 %v2724_v17 }
  0xb5   : > { %955 = vmatmul.f32.vlgmr.msra.gmra.mxu2 %v2723_v16  ;;  %975 = vmatmul.f32.vlgmr.msra.gmra.mxu3 %v2724_v17  ;;  %v2336_v18 = vpack.i.bf16 %v992_v15, %v991_v2 }
  0xb6   : > { %2327 = vrot.lane.b32.xlu0 %v2326_v1, %s2733_s7  ;;  %1274 = vrot.lane.b32.xlu2 %v3786_v14, %s2734_s8 }
  0xb7   : > { %2337 = vrot.lane.b32.xlu1 %v2336_v18, %s2735_s30 }
  0xbe   : > { %2332 = vrot.lane.b32.xlu0 %v2336_v18, %s2736_s9  ;;  %2322 = vrot.lane.b32.xlu2 %v2326_v1, %s2737_s10 }
  0xc6   : > { %1276 = vrot.lane.b32.xlu2 %v3784_v13, %s2734_s8 }
  0xcb   : > { %v676_v19 = vpop.f32.mrf.mxu0  ;;  %v696_v20 = vpop.f32.mrf.mxu1 }
  0xcc   : > { %v3802_v21 = vadd.f32 %v696_v20, %v676_v19 }
  0xce   : > { %1278 = vrot.lane.b32.xlu0 %v3802_v21, %s2734_s8  ;;  %v2341_v22 = vpack.i.bf16 %v3802_v21, %v3784_v13  ;;  %v993_v23 = vrot.slane %v3802_v21, 4 }
  0xd0   : > { %2342 = vrot.lane.b32.xlu1 %v2341_v22, %s2738_s11  ;;  %v2346_v24 = vpack.i.bf16 %v993_v23, %v992_v15 }
  0xd2   : > { %2347 = vrot.lane.b32.xlu2 %v2346_v24, %s2739_s12 }
  0xd4   : > { %v716_v25 = vpop.f32.mrf.mxu2  ;;  %v736_v26 = vpop.f32.mrf.mxu3 }
  0xd5   : > { %v3811_v27 = vadd.f32 %v736_v26, %v716_v25 }
  0xd6   : > { %2352 = vrot.lane.b32.xlu0 %v2346_v24, %s2740_s13 }
  0xd7   : > { %v2361_v28 = vpack.i.bf16 %v3811_v27, %v3802_v21  ;;  %v994_v29 = vrot.slane %v3811_v27, 4 }
  0xd9   : > { %2362 = vrot.lane.b32.xlu1 %v2361_v28, %s2733_s7  ;;  %v2371_v30 = vpack.i.bf16 %v994_v29, %v993_v23 }
  0xdb   : > { %2372 = vrot.lane.b32.xlu2 %v2371_v30, %s2735_s30 }
  0xde   : > { %2357 = vrot.lane.b32.xlu0 %v2361_v28, %s2737_s10 }
  0xe1   : > { %1280 = vrot.lane.b32.xlu1 %v3811_v27, %s2734_s8 }
  0xe6   : > { %2367 = vrot.lane.b32.xlu0 %v2371_v30, %s2736_s9 }
  0xed   : > { %v756_v31 = vpop.f32.mrf.mxu0  ;;  %v776_v32 = vpop.f32.mrf.mxu1 }
  0xee   : > { %v3823_v33 = vadd.f32 %v776_v32, %v756_v31 }
  0xf0   : > { %1282 = vrot.lane.b32.xlu2 %v3823_v33, %s2734_s8  ;;  %v2376_v34 = vpack.i.bf16 %v3823_v33, %v3811_v27  ;;  %v995_v35 = vrot.slane %v3823_v33, 4 }
  0xf2   : > { %2377 = vrot.lane.b32.xlu0 %v2376_v34, %s2738_s11  ;;  %v2381_v36 = vpack.i.bf16 %v995_v35, %v994_v29 }
  0xf4   : > { %2382 = vrot.lane.b32.xlu1 %v2381_v36, %s2739_s12  ;;  %v796_v37 = vpop.f32.mrf.mxu2  ;;  %v816_v38 = vpop.f32.mrf.mxu3 }
  0xf5   : > { %v3832_v39 = vadd.f32 %v816_v38, %v796_v37 }
  0xf7   : > { %v996_v40 = vrot.slane %v3832_v39, 4  ;;  %v2391_v42 = vpack.i.bf16 %v3832_v39, %v3823_v33 }
  0xf9   : > { %v2401_v41 = vpack.i.bf16 %v996_v40, %v995_v35 }
  0xfa   : > { %1284 = vrot.lane.b32.xlu0 %v3832_v39, %s2734_s8 }
  0xfc   : > { %2387 = vrot.lane.b32.xlu1 %v2381_v36, %s2740_s13 }
 0x102   : > { %2402 = vrot.lane.b32.xlu0 %v2401_v41, %s2735_s30 }
 0x104   : > { %2392 = vrot.lane.b32.xlu1 %v2391_v42, %s2737_s10 }
 0x10c   : > { %2397 = vrot.lane.b32.xlu1 %v2401_v41, %s2736_s9 }
 0x10f   : > { %v836_v43 = vpop.f32.mrf.mxu0  ;;  %v856_v44 = vpop.f32.mrf.mxu1 }
 0x110   : > { %v3845_v45 = vadd.f32 %v856_v44, %v836_v43  ;;  %v1275_v46 = vpop.permute.xlu2 %1274 }
 0x112   : > { %v2411_v47 = vpack.i.bf16 %v3845_v45, %v3786_v14  ;;  %v2406_v48 = vpack.i.bf16 %v3845_v45, %v3823_v33  ;;  %v997_v49 = vrot.slane %v3845_v45, 4 }
 0x114   : > { %2412 = vrot.lane.b32.xlu2 %v2411_v47, %s2738_s11  ;;  %2407 = vrot.lane.b32.xlu0 %v2406_v48, %s2733_s7  ;;  %v2421_v50 = vpack.i.bf16 %v997_v49, %v991_v2 }
 0x116   : > { %v876_v51 = vpop.f32.mrf.mxu2  ;;  %v896_v52 = vpop.f32.mrf.mxu3  ;;  %2422 = vrot.lane.b32.xlu1 %v2421_v50, %s2740_s13 }
 0x117   : > { %v3857_v53 = vadd.f32 %v896_v52, %v876_v51 }
 0x118   : > { %v3859_v54 = vpop.permute.xlu2 %2322 }
 0x119   : > { %v998_v55 = vrot.slane %v3857_v53, 4  ;;  %v2325_v56 = vunpack.i.h.bf16 %v3859_v54  ;;  %v2324_v57 = vunpack.i.l.bf16 %v3859_v54  ;;  %v2426_v62 = vpack.i.bf16 %v3857_v53, %v3845_v45 }
 0x11b   : > { %v1061_v58 = vsel %vm1060_vm0, %v2324_v57, %v2325_v56  ;;  %v2431_v59 = vpack.i.bf16 %v998_v55, %v997_v49 }
 0x11c   : > { %1286 = vrot.lane.b32.xlu2 %v3845_v45, %s2734_s8  ;;  %2417 = vrot.lane.b32.xlu0 %v2421_v50, %s2739_s12 }
 0x11e   : > { %2432 = vrot.lane.b32.xlu1 %v2431_v59, %s2736_s9 }
 0x120   : > { %v1277_v60 = vpop.permute.xlu2 %1276 }
 0x121   : > { %v1295_v61 = vsel %vm1294_vm1, %v1275_v46, %v1277_v60 }
 0x122   : > { %2267 = vmatpush.msk.msrb.mxu0 %vm1304_vm2, %v1295_v61 }
 0x124   : > { %2427 = vrot.lane.b32.xlu2 %v2426_v62, %s2737_s10  ;;  %1288 = vrot.lane.b32.xlu0 %v3857_v53, %s2734_s8 }
 0x126   : > { %2437 = vrot.lane.b32.xlu1 %v2431_v59, %s2735_s30 }
 0x128   : > { %v2328_v0 = vpop.permute.xlu0 %2327 }
 0x129   : > { %v3879_v63 = vpop.permute.xlu1 %2337  ;;  %v2330_v5 = vunpack.i.h.bf16 %v2328_v0  ;;  %v2329_v6 = vunpack.i.l.bf16 %v2328_v0 }
 0x12a   : > { %v2340_v3 = vunpack.i.h.bf16 %v3879_v63  ;;  %v2339_v4 = vunpack.i.l.bf16 %v3879_v63 }
 0x12b   : > { %v3890_v9 = vsel %vm1138_vm4, %v2329_v6, %v2330_v5 }
 0x12c   : > { %v1100_v7 = vsel %vm1099_vm3, %v2339_v4, %v2340_v3  ;;  %v3904_v20 = vpop.permute.xlu2 %2347 }
 0x12d   : > { %v3887_v8 = vsel %vm1304_vm2, %v1061_v58, %v1100_v7  ;;  %v2350_v25 = vunpack.i.h.bf16 %v3904_v20  ;;  %v2349_v26 = vunpack.i.l.bf16 %v3904_v20 }
 0x12f   : > { %v1257_v36 = vsel %vm1255_vm6, %v2349_v26, %v2350_v25 }
 0x130   : > { %v3900_v16 = vpop.permute.xlu0 %2332 }
 0x131   : > { %v916_v10 = vpop.f32.mrf.mxu0  ;;  %v936_v11 = vpop.f32.mrf.mxu1  ;;  %v2335_v54 = vunpack.i.h.bf16 %v3900_v16 }
 0x132   : > { %v3892_v12 = vadd.f32 %v936_v11, %v916_v10 }
 0x134   : > { %1290 = vrot.lane.b32.xlu1 %v3892_v12, %s2734_s8  ;;  %v2441_v15 = vpack.i.bf16 %v3892_v12, %v3857_v53  ;;  %v999_v1 = vrot.slane %v3892_v12, 4 }
 0x135   : > { %v3934_v44 = vpop.permute.xlu2 %2372 }
 0x136   : > { %2442 = vrot.lane.b32.xlu2 %v2441_v15, %s2738_s11  ;;  %v2451_v2 = vpack.i.bf16 %v999_v1, %v998_v55  ;;  %v2374_v49 = vunpack.i.l.bf16 %v3934_v44 }
 0x138   : > { %v956_v17 = vpop.f32.mrf.mxu2  ;;  %v976_v18 = vpop.f32.mrf.mxu3  ;;  %2452 = vrot.lane.b32.xlu0 %v2451_v2, %s2739_s12  ;;  %v1101_v59 = vsel %vm1099_vm3, %v2340_v3, %v2374_v49 }
 0x139   : > { %v977_v19 = vadd.f32 %v976_v18, %v956_v17 }
 0x13b   : > { %v2461_v22 = vpack.i.bf16 %v977_v19, %v3892_v12  ;;  %v1000_v23 = vrot.slane %v977_v19, 4  ;;  %v2466_v29 = vpack.i.bf16 %v977_v19, %v3832_v39 }
 0x13c   : > { %2447 = vrot.lane.b32.xlu1 %v2441_v15, %s2733_s7 }
 0x13d   : > { %v2476_v34 = vpack.i.bf16 %v1000_v23, %v999_v1  ;;  %v2491_v41 = vpack.i.bf16 %v1000_v23, %v996_v40 }
 0x13e   : > { %2457 = vrot.lane.b32.xlu2 %v2451_v2, %s2740_s13 }
 0x140   : > { %2462 = vrot.lane.b32.xlu0 %v2461_v22, %s2737_s10  ;;  %v1279_v24 = vpop.permute.xlu0 %1278 }
 0x141   : > { %v1296_v28 = vsel %vm1294_vm1, %v1277_v60, %v1279_v24 }
 0x142   : > { %v3913_v30 = vpop.permute.xlu1 %2342  ;;  %2269 = vmatpush.msk.msrb.mxu2 %vm1304_vm2, %v1296_v28  ;;  %v2375_v28 = vunpack.i.h.bf16 %v3934_v44 }
 0x143   : > { %v2345_v31 = vunpack.i.h.bf16 %v3913_v30  ;;  %v2344_v32 = vunpack.i.l.bf16 %v3913_v30 }
 0x144   : > { %2467 = vrot.lane.b32.xlu1 %v2466_v29, %s2738_s11 }
 0x145   : > { %v1218_v35 = vsel %vm1216_vm5, %v2344_v32, %v2345_v31 }
 0x146   : > { %2477 = vrot.lane.b32.xlu2 %v2476_v34, %s2736_s9  ;;  %v1333_v37 = vsel %vm1304_vm2, %v1218_v35, %v1257_v36 }
 0x147   : > { %1402 = vmatpush.msrb.mxu2 %v1333_v37 }
 0x148   : > { %2472 = vrot.lane.b32.xlu0 %v2466_v29, %s2733_s7  ;;  %v3928_v38 = vpop.permute.xlu0 %2352 }
 0x149   : > { %v2355_v42 = vunpack.i.h.bf16 %v3928_v38  ;;  %v2354_v43 = vunpack.i.l.bf16 %v3928_v38 }
 0x14a   : > { %v3950_v55 = vpop.permute.xlu2 %1282 }
 0x14b   : > { %v3936_v46 = vpop.permute.xlu1 %2362  ;;  %v1179_v40 = vsel %vm1177_vm7, %v2354_v43, %v2355_v42 }
 0x14c   : > { %2492 = vrot.lane.b32.xlu1 %v2491_v41, %s2740_s13  ;;  %v2364_v47 = vunpack.i.l.bf16 %v3936_v46  ;;  %v2365_v22 = vunpack.i.h.bf16 %v3936_v46 }
 0x14e   : > { %2482 = vrot.lane.b32.xlu2 %v2476_v34, %s2735_s30  ;;  %v1140_v48 = vsel %vm1138_vm4, %v2330_v5, %v2364_v47  ;;  %v1141_v34 = vsel %vm1138_vm4, %v2364_v47, %v2365_v22 }
 0x14f   : > { %v1324_v50 = vsel %vm1304_vm2, %v1140_v48, %v1179_v40 }
 0x150   : > { %1403 = vmatpush.msrb.mxu2 %v1324_v50  ;;  %v3947_v51 = vpop.permute.xlu0 %2357 }
 0x151   : > { %v2359_v52 = vunpack.i.l.bf16 %v3947_v51  ;;  %v2360_v23 = vunpack.i.h.bf16 %v3947_v51 }
 0x153   : > { %v1281_v57 = vpop.permute.xlu1 %1280  ;;  %v1062_v58 = vsel %vm1060_vm0, %v2325_v56, %v2359_v52  ;;  %v1063_v36 = vsel %vm1060_vm0, %v2359_v52, %v2360_v23 }
 0x154   : > { %v1298_v60 = vsel %vm1294_vm1, %v1281_v57, %v3950_v55  ;;  %v1315_v61 = vsel %vm1304_vm2, %v1062_v58, %v1101_v59  ;;  %v1297_v3 = vsel %vm1294_vm1, %v1279_v24, %v1281_v57  ;;  %v4027_v58 = vld [vmem:[%s4680_s4] sm:$0xff] }
 0x155   : > { %2273 = vmatpush.msk.msrb.mxu3 %vm1304_vm2, %v1298_v60  ;;  %1404 = vmatpush.msrb.mxu2 %v1315_v61 }
 0x156   : > { %2487 = vrot.lane.b32.xlu2 %v2491_v41, %s2739_s12  ;;  %v1102_v41 = vsel %vm1099_vm3, %v2374_v49, %v2375_v28 }
 0x157   : > { %v1316_v44 = vsel %vm1304_vm2, %v1063_v36, %v1102_v41 }
 0x158   : > { %v3963_v62 = vpop.permute.xlu0 %2367 }
 0x159   : > { %v2369_v56 = vunpack.i.l.bf16 %v3963_v62  ;;  %v2370_v29 = vunpack.i.h.bf16 %v3963_v62 }
 0x15b   : > { %v1023_v63 = vsel %vm1021_vm8, %v2335_v54, %v2369_v56  ;;  %v1024_v46 = vsel %vm1021_vm8, %v2369_v56, %v2370_v29 }
 0x15c   : > { %v1306_v0 = vsel %vm1304_vm2, %v3784_v13, %v1023_v63  ;;  %v1307_v51 = vsel %vm1304_vm2, %v3802_v21, %v1024_v46 }
 0x15d   : > { %1405 = vmatpush.msrb.mxu2 %v1306_v0 }
 0x15e   : > { %1292 = vrot.lane.b32.xlu2 %v977_v19, %s2734_s8  ;;  %2270 = vmatmul.msk.f32.vlgmr.msrb.gmra.mxu2 %vm1348_vm9, %v4027_v58 }
 0x15f   : > { %2271 = vmatpush.msk.msra.mxu2 %vm1304_vm2, %v1297_v3 }
 0x164   : > { %v3975_v4 = vpop.permute.xlu0 %2377 }
 0x165   : > { %v2380_v5 = vunpack.i.h.bf16 %v3975_v4  ;;  %v2379_v6 = vunpack.i.l.bf16 %v3975_v4 }
 0x166   : > { %v3979_v7 = vpop.permute.xlu1 %2382 }
 0x167   : > { %v2385_v10 = vunpack.i.h.bf16 %v3979_v7  ;;  %v2384_v11 = vunpack.i.l.bf16 %v3979_v7  ;;  %v1219_v13 = vsel %vm1216_vm5, %v2345_v31, %v2379_v6  ;;  %v1220_v1 = vsel %vm1216_vm5, %v2379_v6, %v2380_v5 }
 0x169   : > { %v1258_v15 = vsel %vm1255_vm6, %v2350_v25, %v2384_v11  ;;  %v1259_v2 = vsel %vm1255_vm6, %v2384_v11, %v2385_v10  ;;  %v2741_v11 = vmov 0  }
 0x16a   : > { %v1334_v17 = vsel %vm1304_vm2, %v1219_v13, %v1258_v15  ;;  %v1335_v18 = vsel %vm1304_vm2, %v1220_v1, %v1259_v2  ;;  %2496 = vset.pattern.permute.xlu0 %v2741_v11  ;;  %v1342_v13 = vld [vmem:[%s4679_s3] sm:$0xff] }
 0x16b   : > { %1422 = vmatpush.msra.mxu2 %v1334_v17  ;;  %1442 = vmatpush.msrb.mxu3 %v1335_v18 }
 0x16c   : > { %v3993_v19 = vpop.permute.xlu0 %1284  ;;  %1345 = vperm.xlu0 %2496, %v1342_v13  }
 0x16e   : > { %v3997_v24 = vpop.permute.xlu2 %2412  ;;  %v3999_v25 = vpop.permute.xlu1 %2387 }
 0x16f   : > { %v2389_v31 = vunpack.i.l.bf16 %v3999_v25  ;;  %v2390_v62 = vunpack.i.h.bf16 %v3999_v25 }
 0x171   : > { %v1180_v35 = vsel %vm1177_vm7, %v2355_v42, %v2389_v31  ;;  %v1181_v2 = vsel %vm1177_vm7, %v2389_v31, %v2390_v62 }
 0x172   : > { %v1325_v37 = vsel %vm1304_vm2, %v1141_v34, %v1180_v35 }
 0x173   : > { %1423 = vmatpush.msra.mxu2 %v1325_v37  ;;  %v2414_v37 = vunpack.i.l.bf16 %v3997_v24 }
 0x174   : > { %v4010_v48 = vpop.permute.xlu0 %2402 }
 0x175   : > { %v2405_v40 = vunpack.i.h.bf16 %v4010_v48  ;;  %v2404_v50 = vunpack.i.l.bf16 %v4010_v48  ;;  %1424 = vmatpush.msra.mxu2 %v1316_v44  ;;  %v1217_v46 = vsel %vm1216_vm5, %v2414_v37, %v2344_v32 }
 0x176   : > { %v1287_v47 = vpop.permute.xlu2 %1286  ;;  %v4015_v42 = vpop.permute.xlu1 %2392 }
 0x177   : > { %v1300_v49 = vsel %vm1294_vm1, %v3993_v19, %v1287_v47  ;;  %v2395_v52 = vunpack.i.h.bf16 %v4015_v42  ;;  %v2394_v57 = vunpack.i.l.bf16 %v4015_v42  ;;  %1425 = vmatpush.msra.mxu2 %v1307_v51  ;;  %v1104_v59 = vsel %vm1099_vm3, %v2404_v50, %v2405_v40 }
 0x178   : > { %2277 = vmatpush.msk.msrb.mxu1 %vm1304_vm2, %v1300_v49  ;;  %2272 = vmatmul.msk.f32.vlgmr.msra.gmra.mxu2 %vm1348_vm9, %v4027_v58  ;;  %v1103_v34 = vsel %vm1099_vm3, %v2375_v28, %v2404_v50 }
 0x179   : > { %v1065_v21 = vsel %vm1060_vm0, %v2394_v57, %v2395_v52  ;;  %v1064_v17 = vsel %vm1060_vm0, %v2360_v23, %v2394_v57  ;;  %v2742_v23 = vmov 1  }
 0x17a   : > { %v4038_v60 = vsel %vm1304_vm2, %v1065_v21, %v1104_v59  ;;  %v1317_v36 = vsel %vm1304_vm2, %v1064_v17, %v1103_v34  ;;  %2497 = vset.pattern.permute.xlu1 %v2742_v23  ;;  %v2415_v59 = vunpack.i.h.bf16 %v3997_v24 }
 0x17b   : > { %1560 = vperm.xlu1 %2497, %v1342_v13  }
 0x17e   : > { %v4040_v61 = vpop.permute.xlu1 %2397  ;;  %v4049_v3 = vpop.permute.xlu2 %2427 }
 0x17f   : > { %v2399_v63 = vunpack.i.l.bf16 %v4040_v61  ;;  %v2429_v49 = vunpack.i.l.bf16 %v4049_v3  ;;  %v2400_v7 = vunpack.i.h.bf16 %v4040_v61 }
 0x181   : > { %v1025_v35 = vsel %vm1021_vm8, %v2370_v29, %v2399_v63 }
 0x182   : > { %v1308_v29 = vsel %vm1304_vm2, %v3811_v27, %v1025_v35 }
 0x183   : > { %2719 = vset.pattern.permute.xlu1 %v2741_v11 }
 0x186   : > { %v4045_v56 = vpop.permute.xlu0 %2407 }
 0x187   : > { %v2409_v0 = vunpack.i.l.bf16 %v4045_v56 }
 0x188   : > { %v4051_v6 = vpop.permute.xlu1 %2422 }
 0x189   : > { %v2424_v15 = vunpack.i.l.bf16 %v4051_v6  ;;  %v1142_v1 = vsel %vm1138_vm4, %v2365_v22, %v2409_v0 }
 0x18a   : > { %v1326_v18 = vsel %vm1304_vm2, %v1142_v1, %v1181_v2  ;;  %v2430_v1 = vunpack.i.h.bf16 %v4049_v3 }
 0x18b   : > { %1443 = vmatpush.msrb.mxu3 %v1326_v18  ;;  %v1178_v22 = vsel %vm1177_vm7, %v2424_v15, %v2354_v43 }
 0x18c   : > { %v1323_v31 = vsel %vm1304_vm2, %v3890_v9, %v1178_v22  ;;  %v2334_v9 = vunpack.i.l.bf16 %v3900_v16  ;;  %v1299_v16 = vsel %vm1294_vm1, %v3950_v55, %v3993_v19  ;;  %v2743_v55 = vmov 2  }
 0x18d   : > { %1444 = vmatpush.msrb.mxu3 %v1317_v36  ;;  %2498 = vset.pattern.permute.xlu2 %v2743_v55  ;;  %v2410_v36 = vunpack.i.h.bf16 %v4045_v56  ;;  %v1026_v56 = vsel %vm1021_vm8, %v2399_v63, %v2400_v7 }
 0x18e   : > { %v4076_v28 = vpop.permute.xlu0 %2417  ;;  %v1022_v51 = vsel %vm1021_vm8, %v2334_v9, %v2335_v54  ;;  %2721 = vset.pattern.permute.xlu0 %v2743_v55  ;;  %1573 = vperm.xlu2 %2498, %v1342_v13  }
 0x18f   : > { %v2419_v38 = vunpack.i.l.bf16 %v4076_v28  ;;  %1445 = vmatpush.msrb.mxu3 %v1308_v29  ;;  %v1305_v32 = vsel %vm1304_vm2, %v3786_v14, %v1022_v51  ;;  %v2420_v11 = vunpack.i.h.bf16 %v4076_v28 }
 0x190   : > { %v4081_v43 = vpop.permute.xlu2 %2442  ;;  %v4083_v41 = vpop.permute.xlu1 %2432  ;;  %2274 = vmatmul.msk.f32.vlgmr.msrb.gmra.mxu3 %vm1348_vm9, %v4027_v58 }
 0x191   : > { %v1256_v27 = vsel %vm1255_vm6, %v2419_v38, %v2349_v26  ;;  %v2445_v48 = vunpack.i.h.bf16 %v4081_v43  ;;  %v2435_v38 = vunpack.i.h.bf16 %v4083_v41  ;;  %v2434_v9 = vunpack.i.l.bf16 %v4083_v41 }
 0x192   : > { %v1332_v44 = vsel %vm1304_vm2, %v1217_v46, %v1256_v27 }
 0x193   : > { %1382 = vmatpush.msrb.mxu0 %v1332_v44  ;;  %v1028_v55 = vsel %vm1021_vm8, %v2434_v9, %v2435_v38 }
 0x195   : > { %1383 = vmatpush.msrb.mxu0 %v1323_v31  ;;  %v2425_v31 = vunpack.i.h.bf16 %v4051_v6 }
 0x196   : > { %v1289_v50 = vpop.permute.xlu0 %1288  ;;  %2720 = vset.pattern.permute.xlu2 %v2742_v23 }
 0x197   : > { %v1301_v30 = vsel %vm1294_vm1, %v1287_v47, %v1289_v50  ;;  %1384 = vmatpush.msrb.mxu0 %v3887_v8  ;;  %v1066_v8 = vsel %vm1060_vm0, %v2395_v52, %v2429_v49 }
 0x198   : > { %v4100_v57 = vpop.permute.xlu2 %2457  ;;  %2279 = vmatpush.msk.msrb.mxu2 %vm1304_vm2, %v1301_v30  ;;  %v4104_v20 = vpop.permute.xlu1 %2437 }
 0x199   : > { %v2439_v26 = vunpack.i.l.bf16 %v4104_v20  ;;  %1385 = vmatpush.msrb.mxu0 %v1305_v32  ;;  %v2460_v2 = vunpack.i.h.bf16 %v4100_v57  ;;  %v2459_v17 = vunpack.i.l.bf16 %v4100_v57  ;;  %v2440_v18 = vunpack.i.h.bf16 %v4104_v20 }
 0x19a   : > { %2268 = vmatmul.msk.f32.vlgmr.msrb.gmra.mxu0 %vm1348_vm9, %v4027_v58 }
 0x19b   : > { %v1105_v54 = vsel %vm1099_vm3, %v2405_v40, %v2439_v26  ;;  %2275 = vmatpush.msk.msra.mxu0 %vm1304_vm2, %v1299_v16  ;;  %v2444_v40 = vunpack.i.l.bf16 %v4081_v43  ;;  %v1184_v23 = vsel %vm1177_vm7, %v2425_v31, %v2459_v17  ;;  %v1185_v6 = vsel %vm1177_vm7, %v2459_v17, %v2460_v2 }
 0x19c   : > { %v4124_v14 = vsel %vm1304_vm2, %v1066_v8, %v1105_v54  ;;  %v1106_v44 = vsel %vm1099_vm3, %v2439_v26, %v2440_v18  ;;  %v1067_v54 = vsel %vm1060_vm0, %v2429_v49, %v2430_v1 }
 0x19d   : > { %v1223_v34 = vsel %vm1216_vm5, %v2415_v59, %v2444_v40  ;;  %v1224_v24 = vsel %vm1216_vm5, %v2444_v40, %v2445_v48 }
 0x1a0   : > { %v4126_v47 = vpop.permute.xlu2 %2477 }
 0x1a6   : > { %v4128_v19 = vpop.permute.xlu1 %1290 }
 0x1a7   : > { %v1302_v42 = vsel %vm1294_vm1, %v1289_v50, %v4128_v19  ;;  %v2479_v50 = vunpack.i.l.bf16 %v4126_v47 }
 0x1a8   : > { %v4132_v52 = vpop.permute.xlu2 %2482  ;;  %2281 = vmatpush.msk.msra.mxu3 %vm1304_vm2, %v1302_v42  ;;  %v1320_v42 = vsel %vm1304_vm2, %v1067_v54, %v1106_v44 }
 0x1a9   : > { %v2484_v51 = vunpack.i.l.bf16 %v4132_v52  ;;  %v1029_v3 = vsel %vm1021_vm8, %v2435_v38, %v2479_v50 }
 0x1aa   : > { %v4137_v21 = vpop.permute.xlu0 %2452 }
 0x1ab   : > { %v2455_v13 = vunpack.i.h.bf16 %v4137_v21  ;;  %v2454_v15 = vunpack.i.l.bf16 %v4137_v21  ;;  %v1107_v17 = vsel %vm1099_vm3, %v2440_v18, %v2484_v51 }
 0x1ad   : > { %v1262_v35 = vsel %vm1255_vm6, %v2420_v11, %v2454_v15  ;;  %v1263_v22 = vsel %vm1255_vm6, %v2454_v15, %v2455_v13 }
 0x1ae   : > { %v4157_v37 = vpop.permute.xlu1 %2447  ;;  %v1338_v28 = vsel %vm1304_vm2, %v1223_v34, %v1262_v35  ;;  %v1339_v29 = vsel %vm1304_vm2, %v1224_v24, %v1263_v22  ;;  %v1311_v34 = vsel %vm1304_vm2, %v3845_v45, %v1028_v55 }
 0x1af   : > { %v2450_v46 = vunpack.i.h.bf16 %v4157_v37  ;;  %v2449_v27 = vunpack.i.l.bf16 %v4157_v37  ;;  %1502 = vmatpush.msrb.mxu2 %v1338_v28  ;;  %1522 = vmatpush.msra.mxu3 %v1339_v29 }
 0x1b0   : > { %v4176_v20 = vpop.permute.xlu2 %2487 }
 0x1b1   : > { %v1145_v41 = vsel %vm1138_vm4, %v2410_v36, %v2449_v27  ;;  %v1146_v30 = vsel %vm1138_vm4, %v2449_v27, %v2450_v46  ;;  %v2489_v40 = vunpack.i.l.bf16 %v4176_v20  ;;  %v2490_v25 = vunpack.i.h.bf16 %v4176_v20 }
 0x1b2   : > { %v4178_v32 = vpop.permute.xlu0 %2462  ;;  %v1329_v16 = vsel %vm1304_vm2, %v1145_v41, %v1184_v23  ;;  %v1330_v8 = vsel %vm1304_vm2, %v1146_v30, %v1185_v6 }
 0x1b3   : > { %v2464_v26 = vunpack.i.l.bf16 %v4178_v32  ;;  %1503 = vmatpush.msrb.mxu2 %v1329_v16  ;;  %1523 = vmatpush.msra.mxu3 %v1330_v8  ;;  %v1260_v45 = vsel %vm1255_vm6, %v2385_v10, %v2489_v40  ;;  %v1261_v28 = vsel %vm1255_vm6, %v2489_v40, %v2420_v11  ;;  %v2465_v61 = vunpack.i.h.bf16 %v4178_v32 }
 0x1b4   : > { %v1264_v43 = vsel %vm1255_vm6, %v2455_v13, %v2490_v25 }
 0x1b5   : > { %1504 = vmatpush.msrb.mxu2 %v1320_v42  ;;  %v1068_v15 = vsel %vm1060_vm0, %v2430_v1, %v2464_v26  ;;  %v1312_v1 = vsel %vm1304_vm2, %v3857_v53, %v1029_v3 }
 0x1b6   : > { %v2468_v49 = vpop.permute.xlu1 %2467  ;;  %v1321_v35 = vsel %vm1304_vm2, %v1068_v15, %v1107_v17 }
 0x1b7   : > { %v2469_v24 = vunpack.i.l.bf16 %v2468_v49  ;;  %1505 = vmatpush.msrb.mxu2 %v1311_v34  ;;  %1524 = vmatpush.msra.mxu3 %v1321_v35  ;;  %v2470_v41 = vunpack.i.h.bf16 %v2468_v49 }
 0x1b8   : > { %2280 = vmatmul.msk.f32.vlgmr.msrb.gmra.mxu2 %vm1348_vm9, %v4027_v58 }
 0x1b9   : > { %1525 = vmatpush.msra.mxu3 %v1312_v1  ;;  %v1221_v18 = vsel %vm1216_vm5, %v2380_v5, %v2469_v24  ;;  %v1222_v22 = vsel %vm1216_vm5, %v2469_v24, %v2415_v59  ;;  %v1225_v63 = vsel %vm1216_vm5, %v2445_v48, %v2470_v41 }
 0x1ba   : > { %v2473_v29 = vpop.permute.xlu0 %2472  ;;  %2282 = vmatmul.msk.f32.vlgmr.msra.gmra.mxu3 %vm1348_vm9, %v4027_v58  ;;  %v1336_v38 = vsel %vm1304_vm2, %v1221_v18, %v1260_v45  ;;  %v1337_v53 = vsel %vm1304_vm2, %v1222_v22, %v1261_v28 }
 0x1bb   : > { %1462 = vmatpush.msra.mxu0 %v1336_v38  ;;  %1482 = vmatpush.msrb.mxu1 %v1337_v53  ;;  %v2474_v4 = vunpack.i.l.bf16 %v2473_v29  ;;  %v2475_v16 = vunpack.i.h.bf16 %v2473_v29 }
 0x1bd   : > { %v1143_v10 = vsel %vm1138_vm4, %v2409_v0, %v2474_v4  ;;  %v1144_v11 = vsel %vm1138_vm4, %v2474_v4, %v2410_v36  ;;  %v1027_v0 = vsel %vm1021_vm8, %v2400_v7, %v2434_v9  ;;  %v1309_v36 = vsel %vm1304_vm2, %v3823_v33, %v1026_v56 }
 0x1be   : > { %v2493_v5 = vpop.permute.xlu1 %2492  ;;  %v2480_v33 = vunpack.i.h.bf16 %v4126_v47  ;;  %v1147_v48 = vsel %vm1138_vm4, %v2450_v46, %v2475_v16  ;;  %v1069_v9 = vsel %vm1060_vm0, %v2464_v26, %v2465_v61 }
 0x1bf   : > { %v2494_v27 = vunpack.i.l.bf16 %v2493_v5  ;;  %v2495_v30 = vunpack.i.h.bf16 %v2493_v5 }
 0x1c0   : > { %v1030_v21 = vsel %vm1021_vm8, %v2479_v50, %v2480_v33 }
 0x1c1   : > { %v1182_v59 = vsel %vm1177_vm7, %v2390_v62, %v2494_v27  ;;  %v1183_v23 = vsel %vm1177_vm7, %v2494_v27, %v2425_v31  ;;  %v1293_v62 = vpop.permute.xlu2 %1292  ;;  %v1310_v31 = vsel %vm1304_vm2, %v3832_v39, %v1027_v0  ;;  %v2485_v39 = vunpack.i.h.bf16 %v4132_v52 }
 0x1c2   : > { %v1327_v6 = vsel %vm1304_vm2, %v1143_v10, %v1182_v59  ;;  %v1328_v44 = vsel %vm1304_vm2, %v1144_v11, %v1183_v23 }
 0x1c3   : > { %1463 = vmatpush.msra.mxu0 %v1327_v6  ;;  %1483 = vmatpush.msrb.mxu1 %v1328_v44  ;;  %v1108_v57 = vsel %vm1099_vm3, %v2484_v51, %v2485_v39 }
 0x1c4   : > { %v1322_v13 = vsel %vm1304_vm2, %v1069_v9, %v1108_v57 }
 0x1c5   : > { %1464 = vmatpush.msra.mxu0 %v4038_v60  ;;  %1484 = vmatpush.msrb.mxu1 %v4124_v14  ;;  %v1303_v60 = vsel %vm1294_vm1, %v4128_v19, %v1293_v62  ;;  %v1186_v14 = vsel %vm1177_vm7, %v2460_v2, %v2495_v30  ;;  %v1340_v19 = vsel %vm1304_vm2, %v1225_v63, %v1264_v43 }
 0x1c6   : > { %v1331_v20 = vsel %vm1304_vm2, %v1147_v48, %v1186_v14  ;;  %v1313_v2 = vsel %vm1304_vm2, %v3892_v12, %v1030_v21  ;;  %v979_v12 = vld [vmem:[%s4678_s2] sm:$0xff] }
 0x1c7   : > { %1465 = vmatpush.msra.mxu0 %v1309_v36  ;;  %1485 = vmatpush.msrb.mxu1 %v1310_v31  ;;  %v1588_v15 = vperm.slane %v979_v12, 1  ;;  %v1589_v17 = vperm.slane %v979_v12, 2  ;;  %v1587_v18 = vperm.slane %v979_v12, 0  ;;  %v1590_v25 = vperm.slane %v979_v12, 3 }
 0x1c8   : > { %2276 = vmatmul.msk.f32.vlgmr.msra.gmra.mxu0 %vm1348_vm9, %v4027_v58  ;;  %2278 = vmatmul.msk.f32.vlgmr.msrb.gmra.mxu1 %vm1348_vm9, %v4027_v58  ;;  %v1591_v62 = vperm.slane %v979_v12, 4  ;;  %v1593_v30 = vperm.slane %v979_v12, 6  ;;  %v1592_v16 = vperm.slane %v979_v12, 5 }
 0x1c9   : > { %2283 = vmatpush.msk.msrb.mxu0 %vm1304_vm2, %v1303_v60 }
 0x1cb   : > { %1542 = vmatpush.msrb.mxu0 %v1340_v19 }
 0x1cd   : > { %1543 = vmatpush.msrb.mxu0 %v1331_v20 }
 0x1cf   : > { %1544 = vmatpush.msrb.mxu0 %v1322_v13 }
 0x1d1   : > { %1545 = vmatpush.msrb.mxu0 %v1313_v2 }
 0x1d2   : > { %2284 = vmatmul.msk.f32.vlgmr.msrb.gmra.mxu0 %vm1348_vm9, %v4027_v58 }
 0x1de   : > { %v1346_v46 = vpop.permute.xlu0 %1345 }
 0x1e1   : > { %v1407_v37 = vpop.f32.mrf.mxu2 }
 0x1e2   : > { %v1408_v32 = vadd.f32 %v1407_v37, %v1346_v46 }
 0x1e4   : > { %v1551_v8 = vmax.f32 %v1408_v32, 0.0  ;;  %v1594_v32 = vperm.slane %v979_v12, 7 }
 0x1e8   : > { %v1574_v55 = vpop.permute.xlu2 %1573 }
 0x1ed   : > { %v1561_v47 = vpop.permute.xlu1 %1560 }
 0x1ee   : > { %v1564_v54 = vmul.f32 %v1561_v47, %v1551_v8 }
 0x1f0   : > { %v1577_v42 = vadd.f32 %v1574_v55, %v1564_v54 }
 0x1f2   : > { %v1606_v3 = vmul.f32 %v1588_v15, %v1577_v42 }
 0x1fb   : > { %v1427_v52 = vpop.f32.mrf.mxu2 }
 0x1fc   : > { %v1428_v51 = vadd.f32 %v1427_v52, %v1346_v46  ;;  %v2722_v52 = vld [vmem:[%s4678_s2 + $0x8] ss:$0 sm:$0xff] }
 0x1fe   : > { %v1552_v26 = vmax.f32 %v1428_v51, 0.0 }
 0x200   : > { %v1565_v50 = vmul.f32 %v1561_v47, %v1552_v26 }
 0x202   : > { %v1578_v40 = vadd.f32 %v1574_v55, %v1565_v50 }
 0x204   : > { %v1607_v49 = vmul.f32 %v1589_v17, %v1578_v40 }
 0x206   : > { %v2499_v35 = vpack.i.bf16 %v1607_v49, %v1606_v3 }
 0x208   : > { %2500 = vrot.lane.b32.xlu2 %v2499_v35, %s2744_s20 }
 0x213   : > { %v1447_v28 = vpop.f32.mrf.mxu3 }
 0x214   : > { %v1448_v38 = vadd.f32 %v1447_v28, %v1346_v46 }
 0x216   : > { %v1553_v4 = vmax.f32 %v1448_v38, 0.0 }
 0x217   : > { %v1387_v58 = vpop.f32.mrf.mxu0 }
 0x218   : > { %v1388_v34 = vadd.f32 %v1387_v58, %v1346_v46  ;;  %v1566_v27 = vmul.f32 %v1561_v47, %v1553_v4 }
 0x21a   : > { %v1550_v24 = vmax.f32 %v1388_v34, 0.0  ;;  %v1579_v0 = vadd.f32 %v1574_v55, %v1566_v27 }
 0x21c   : > { %v1563_v1 = vmul.f32 %v1561_v47, %v1550_v24  ;;  %v1608_v39 = vmul.f32 %v1590_v25, %v1579_v0 }
 0x21e   : > { %v1576_v45 = vadd.f32 %v1574_v55, %v1563_v1 }
 0x220   : > { %v1605_v22 = vmul.f32 %v1587_v18, %v1576_v45 }
 0x222   : > { %1623 = vrot.lane.b32.xlu1 %v1605_v22, %s2744_s20 }
 0x23b   : > { %v1507_v29 = vpop.f32.mrf.mxu2 }
 0x23c   : > { %v1508_v53 = vadd.f32 %v1507_v29, %v1346_v46 }
 0x23d   : > { %v1527_v7 = vpop.f32.mrf.mxu3 }
 0x23e   : > { %v1556_v5 = vmax.f32 %v1508_v53, 0.0  ;;  %v1528_v44 = vadd.f32 %v1527_v7, %v1346_v46 }
 0x240   : > { %v1569_v11 = vmul.f32 %v1561_v47, %v1556_v5  ;;  %v1557_v63 = vmax.f32 %v1528_v44, 0.0 }
 0x242   : > { %v1582_v36 = vadd.f32 %v1574_v55, %v1569_v11  ;;  %v1570_v9 = vmul.f32 %v1561_v47, %v1557_v63 }
 0x244   : > { %v1611_v19 = vmul.f32 %v1593_v30, %v1582_v36  ;;  %v1583_v2 = vadd.f32 %v1574_v55, %v1570_v9 }
 0x245   : > { %v1467_v10 = vpop.f32.mrf.mxu0  ;;  %v1487_v59 = vpop.f32.mrf.mxu1 }
 0x246   : > { %v1468_v23 = vadd.f32 %v1467_v10, %v1346_v46  ;;  %v1488_v6 = vadd.f32 %v1487_v59, %v1346_v46  ;;  %v1612_v51 = vmul.f32 %v1594_v32, %v1583_v2 }
 0x248   : > { %v1554_v41 = vmax.f32 %v1468_v23, 0.0  ;;  %v1555_v56 = vmax.f32 %v1488_v6, 0.0 }
 0x24a   : > { %v1567_v31 = vmul.f32 %v1561_v47, %v1554_v41  ;;  %v1568_v61 = vmul.f32 %v1561_v47, %v1555_v56 }
 0x24c   : > { %v1580_v60 = vadd.f32 %v1574_v55, %v1567_v31  ;;  %v1581_v33 = vadd.f32 %v1574_v55, %v1568_v61 }
 0x24e   : > { %v1609_v43 = vmul.f32 %v1591_v62, %v1580_v60  ;;  %v1610_v14 = vmul.f32 %v1592_v16, %v1581_v33 }
 0x24f   : > { %v1547_v48 = vpop.f32.mrf.mxu0 }
 0x250   : > { %v1548_v20 = vadd.f32 %v1547_v48, %v1346_v46  ;;  %v2504_v57 = vpack.i.bf16 %v1609_v43, %v1608_v39  ;;  %v2509_v21 = vpack.i.bf16 %v1611_v19, %v1610_v14 }
 0x252   : > { %v1558_v13 = vmax.f32 %v1548_v20, 0.0  ;;  %2505 = vrot.lane.b32.xlu0 %v2504_v57, %s2744_s20  ;;  %2510 = vrot.lane.b32.xlu1 %v2509_v21, %s2744_s20 }
 0x254   : > { %v1571_v37 = vmul.f32 %v1561_v47, %v1558_v13 }
 0x256   : > { %v1584_v8 = vadd.f32 %v1574_v55, %v1571_v37 }
 0x258   : > { %v1613_v26 = vmul.f32 %v2722_v52, %v1584_v8 }
 0x25a   : > { %v2514_v54 = vpack.i.bf16 %v1613_v26, %v1612_v51 }
 0x25c   : > { %2515 = vrot.lane.b32.xlu2 %v2514_v54, %s2744_s20 }
 0x262   : > { %v2501_v46 = vpop.permute.xlu2 %2500 }
 0x263   : > { %v2502_v50 = vunpack.i.l.bf16 %v2501_v46  ;;  %v2503_v55 = vunpack.i.h.bf16 %v2501_v46 }
 0x265   : > { %v4306_v58 = vsel %vm1641_vm10, %v2502_v50, %v2503_v55 }
 0x294   : > { %v4288_v42 = vpop.permute.xlu1 %1623 }
 0x295   : > { %v4292_v40 = vsel %vm1641_vm10, %v4288_v42, %v2502_v50  ;;  %v1660_v47 = vsel %vm1641_vm10, 0.0, %v4288_v42 }
 0x296   : > { %v2534_v12 = vpack.i.bf16 %v4292_v40, %v1660_v47 }
 0x298   : > { %2535 = vrot.lane.b32.xlu1 %v2534_v12, %s2739_s12  ;;  %2525 = vrot.lane.b32.xlu2 %v2534_v12, %s2737_s10 }
 0x299   : > { %2520 = vrot.lane.b32.xlu0 %v2534_v12, %s2736_s9 }
 0x2a0   : > { %2545 = vrot.lane.b32.xlu1 %v2534_v12, %s2740_s13  ;;  %2540 = vrot.lane.b32.xlu2 %v2534_v12, %s2738_s11 }
 0x2a1   : > { %2530 = vrot.lane.b32.xlu0 %v2534_v12, %s2734_s8 }
 0x2a8   : > { %2555 = vrot.lane.b32.xlu2 %v2534_v12, %s2735_s30 }
 0x2a9   : > { %2550 = vrot.lane.b32.xlu0 %v2534_v12, %s2733_s7 }
 0x2b6   : > { %v2516_v22 = vpop.permute.xlu2 %2515 }
 0x2b7   : > { %v2517_v29 = vunpack.i.l.bf16 %v2516_v22  ;;  %v2518_v5 = vunpack.i.h.bf16 %v2516_v22 }
 0x2b9   : > { %v1661_v7 = vsel %vm1641_vm10, %v2518_v5, 0.0  ;;  %v4349_v27 = vsel %vm1641_vm10, %v2517_v29, %v2518_v5 }
 0x2ba   : > { %v2644_v10 = vpack.i.bf16 %v1661_v7, %v4349_v27 }
 0x2c4   : > { %v2506_v15 = vpop.permute.xlu0 %2505  ;;  %v2511_v34 = vpop.permute.xlu1 %2510 }
 0x2c5   : > { %v2507_v17 = vunpack.i.l.bf16 %v2506_v15  ;;  %v2508_v35 = vunpack.i.h.bf16 %v2506_v15  ;;  %v2512_v24 = vunpack.i.l.bf16 %v2511_v34  ;;  %v2513_v28 = vunpack.i.h.bf16 %v2511_v34 }
 0x2c7   : > { %v4309_v3 = vsel %vm1641_vm10, %v2503_v55, %v2507_v17  ;;  %v4320_v1 = vsel %vm1641_vm10, %v2507_v17, %v2508_v35  ;;  %v4323_v18 = vsel %vm1641_vm10, %v2508_v35, %v2512_v24  ;;  %v4337_v38 = vsel %vm1641_vm10, %v2513_v28, %v2517_v29 }
 0x2c8   : > { %v2559_v49 = vpack.i.bf16 %v4309_v3, %v4306_v58  ;;  %v2604_v45 = vpack.i.bf16 %v4323_v18, %v4320_v1  ;;  %v4340_v53 = vsel %vm1641_vm10, %v2512_v24, %v2513_v28 }
 0x2c9   : > { %v2649_v4 = vpack.i.bf16 %v4337_v38, %v4340_v53 }
 0x2ca   : > { %2560 = vrot.lane.b32.xlu1 %v2559_v49, %s2736_s9  ;;  %2575 = vrot.lane.b32.xlu2 %v2559_v49, %s2739_s12 }
 0x2cb   : > { %2565 = vrot.lane.b32.xlu0 %v2559_v49, %s2737_s10 }
 0x2d2   : > { %2580 = vrot.lane.b32.xlu1 %v2559_v49, %s2738_s11  ;;  %2590 = vrot.lane.b32.xlu2 %v2559_v49, %s2733_s7 }
 0x2d3   : > { %2570 = vrot.lane.b32.xlu0 %v2559_v49, %s2734_s8 }
 0x2da   : > { %2595 = vrot.lane.b32.xlu2 %v2559_v49, %s2735_s30  ;;  %2605 = vrot.lane.b32.xlu1 %v2604_v45, %s2737_s10 }
 0x2db   : > { %2585 = vrot.lane.b32.xlu0 %v2559_v49, %s2740_s13 }
 0x2e2   : > { %2610 = vrot.lane.b32.xlu1 %v2604_v45, %s2734_s8  ;;  %2600 = vrot.lane.b32.xlu2 %v2604_v45, %s2736_s9 }
 0x2e3   : > { %2615 = vrot.lane.b32.xlu0 %v2604_v45, %s2739_s12 }
 0x2ea   : > { %2630 = vrot.lane.b32.xlu1 %v2604_v45, %s2733_s7  ;;  %2625 = vrot.lane.b32.xlu2 %v2604_v45, %s2740_s13 }
 0x2eb   : > { %2620 = vrot.lane.b32.xlu0 %v2604_v45, %s2738_s11 }
 0x2f2   : > { %2635 = vrot.lane.b32.xlu1 %v2604_v45, %s2735_s30  ;;  %2650 = vrot.lane.b32.xlu2 %v2649_v4, %s2737_s10  ;;  %v4358_v59 = vpop.permute.xlu2 %2525 }
 0x2f3   : > { %2640 = vrot.lane.b32.xlu0 %v2649_v4, %s2736_s9  ;;  %v2528_v20 = vunpack.i.h.bf16 %v4358_v59  ;;  %v2527_v57 = vunpack.i.l.bf16 %v4358_v59 }
 0x2f5   : > { %v1722_v32 = vsel %vm1060_vm0, %v2527_v57, %v2528_v20 }
 0x2fa   : > { %2645 = vrot.lane.b32.xlu1 %v2644_v10, %s2736_s9  ;;  %2670 = vrot.lane.b32.xlu2 %v2649_v4, %s2740_s13  ;;  %v4367_v6 = vpop.permute.xlu2 %2540 }
 0x2fb   : > { %2665 = vrot.lane.b32.xlu0 %v2649_v4, %s2738_s11  ;;  %v2543_v30 = vunpack.i.h.bf16 %v4367_v6  ;;  %v2542_v36 = vunpack.i.l.bf16 %v4367_v6 }
 0x2fd   : > { %v1874_v33 = vsel %vm1216_vm5, %v2542_v36, %v2543_v30 }
 0x302   : > { %2655 = vrot.lane.b32.xlu1 %v2649_v4, %s2734_s8  ;;  %2680 = vrot.lane.b32.xlu2 %v2649_v4, %s2733_s7  ;;  %v4379_v61 = vpop.permute.xlu2 %2555 }
 0x303   : > { %2675 = vrot.lane.b32.xlu0 %v2644_v10, %s2734_s8  ;;  %v2558_v39 = vunpack.i.h.bf16 %v4379_v61  ;;  %v2557_v14 = vunpack.i.l.bf16 %v4379_v61 }
 0x305   : > { %v1760_v37 = vsel %vm1099_vm3, %v2557_v14, %v2558_v39 }
 0x30a   : > { %2660 = vrot.lane.b32.xlu1 %v2649_v4, %s2739_s12  ;;  %2695 = vrot.lane.b32.xlu2 %v2644_v10, %s2738_s11  ;;  %v4365_v23 = vpop.permute.xlu1 %2535 }
 0x30b   : > { %2685 = vrot.lane.b32.xlu0 %v2644_v10, %s2739_s12  ;;  %v4363_v11 = vpop.permute.xlu0 %2520  ;;  %v2538_v41 = vunpack.i.h.bf16 %v4365_v23  ;;  %v2537_v56 = vunpack.i.l.bf16 %v4365_v23 }
 0x30c   : > { %v2523_v13 = vunpack.i.h.bf16 %v4363_v11  ;;  %v2522_v2 = vunpack.i.l.bf16 %v4363_v11  ;;  %v4505_v11 = vld [vmem:[%s4681_s5] sm:$0xff] }
 0x30d   : > { %v1912_v60 = vsel %vm1255_vm6, %v2537_v56, %v2538_v41 }
 0x30e   : > { %v1684_v52 = vsel %vm1021_vm8, %v2522_v2, %v2523_v13 }
 0x312   : > { %2690 = vrot.lane.b32.xlu1 %v2649_v4, %s2735_s30  ;;  %2710 = vrot.lane.b32.xlu2 %v2644_v10, %s2735_s30  ;;  %v4374_v62 = vpop.permute.xlu1 %2545  ;;  %s4662_s30 = scalar_lea.vmem %s4682_s6, %s2300_s29 }
 0x313   : > { %2700 = vrot.lane.b32.xlu0 %v2644_v10, %s2740_s13  ;;  %v2531_v44 = vpop.permute.xlu0 %2530  ;;  %v2548_v16 = vunpack.i.h.bf16 %v4374_v62  ;;  %v2547_v63 = vunpack.i.l.bf16 %v4374_v62 }
 0x314   : > { %v2533_v0 = vunpack.i.h.bf16 %v2531_v44  ;;  %v2532_v25 = vunpack.i.l.bf16 %v2531_v44 }
 0x315   : > { %v1836_v9 = vsel %vm1177_vm7, %v2547_v63, %v2548_v16 }
 0x316   : > { %v1950_v31 = vsel %vm1294_vm1, %v2532_v25, %v2533_v0 }
 0x317   : > { %1987 = vmatpush.msra.mxu1 %v1950_v31 }
 0x319   : > { %1988 = vmatpush.msra.mxu1 %v1912_v60 }
 0x31a   : > { %2705 = vrot.lane.b32.xlu1 %v2644_v10, %s2733_s7 }
 0x31b   : > { %2715 = vrot.lane.b32.xlu0 %v2644_v10, %s2737_s10  ;;  %v4388_v43 = vpop.permute.xlu0 %2550  ;;  %1989 = vmatpush.msra.mxu1 %v1874_v33 }
 0x31c   : > { %v2553_v19 = vunpack.i.h.bf16 %v4388_v43  ;;  %v2552_v48 = vunpack.i.l.bf16 %v4388_v43 }
 0x31d   : > { %1990 = vmatpush.msra.mxu1 %v1836_v9 }
 0x31e   : > { %v1798_v21 = vsel %vm1138_vm4, %v2552_v48, %v2553_v19 }
 0x31f   : > { %1991 = vmatpush.msra.mxu1 %v1798_v21 }
 0x321   : > { %1992 = vmatpush.msra.mxu1 %v1760_v37 }
 0x323   : > { %1993 = vmatpush.msra.mxu1 %v1722_v32 }
 0x324   : > { %v4412_v8 = vpop.permute.xlu2 %2575 }
 0x325   : > { %1994 = vmatpush.msra.mxu1 %v1684_v52  ;;  %v2578_v12 = vunpack.i.h.bf16 %v4412_v8  ;;  %v2577_v55 = vunpack.i.l.bf16 %v4412_v8 }
 0x327   : > { %2287 = vmatpush.msk.msra.mxu1 %vm2286_vm11, %v4288_v42  ;;  %v1913_v45 = vsel %vm1255_vm6, %v2538_v41, %v2577_v55  ;;  %v1914_v22 = vsel %vm1255_vm6, %v2577_v55, %v2578_v12 }
 0x328   : > { %2288 = vmatmul.msk.f32.vlgmr.msra.gmra.mxu1 %vm1976_vm12, %v4505_v11 }
 0x32c   : > { %v4414_v51 = vpop.permute.xlu2 %2590 }
 0x32d   : > { %v2593_v7 = vunpack.i.h.bf16 %v4414_v51  ;;  %v2592_v10 = vunpack.i.l.bf16 %v4414_v51 }
 0x32f   : > { %v1799_v36 = vsel %vm1138_vm4, %v2553_v19, %v2592_v10  ;;  %v1800_v31 = vsel %vm1138_vm4, %v2592_v10, %v2593_v7 }
 0x334   : > { %v4420_v46 = vpop.permute.xlu2 %2595 }
 0x335   : > { %v2598_v44 = vunpack.i.h.bf16 %v4420_v46  ;;  %v2597_v41 = vunpack.i.l.bf16 %v4420_v46 }
 0x337   : > { %v1761_v60 = vsel %vm1099_vm3, %v2558_v39, %v2597_v41  ;;  %v1762_v33 = vsel %vm1099_vm3, %v2597_v41, %v2598_v44 }
 0x33c   : > { %v4416_v26 = vpop.permute.xlu1 %2560  ;;  %v4430_v24 = vpop.permute.xlu2 %2600 }
 0x33d   : > { %v4418_v54 = vpop.permute.xlu0 %2565  ;;  %v2563_v62 = vunpack.i.h.bf16 %v4416_v26  ;;  %v2603_v51 = vunpack.i.h.bf16 %v4430_v24 }
 0x33e   : > { %v2568_v25 = vunpack.i.h.bf16 %v4418_v54 }
 0x344   : > { %v4422_v50 = vpop.permute.xlu1 %2580  ;;  %v4462_v63 = vpop.permute.xlu2 %2625 }
 0x345   : > { %v2571_v47 = vpop.permute.xlu0 %2570  ;;  %v2583_v42 = vunpack.i.h.bf16 %v4422_v50  ;;  %v2582_v49 = vunpack.i.l.bf16 %v4422_v50 }
 0x346   : > { %v2573_v15 = vunpack.i.h.bf16 %v2571_v47  ;;  %v2572_v17 = vunpack.i.l.bf16 %v2571_v47  ;;  %v2628_v47 = vunpack.i.h.bf16 %v4462_v63 }
 0x347   : > { %v1875_v28 = vsel %vm1216_vm5, %v2543_v30, %v2582_v49  ;;  %v1876_v29 = vsel %vm1216_vm5, %v2582_v49, %v2583_v42  ;;  %v2567_v30 = vunpack.i.l.bf16 %v4418_v54 }
 0x348   : > { %v1951_v34 = vsel %vm1294_vm1, %v2533_v0, %v2572_v17  ;;  %v1952_v35 = vsel %vm1294_vm1, %v2572_v17, %v2573_v15 }
 0x349   : > { %2007 = vmatpush.msra.mxu2 %v1951_v34  ;;  %2027 = vmatpush.msrb.mxu3 %v1952_v35  ;;  %v1723_v39 = vsel %vm1060_vm0, %v2528_v20, %v2567_v30  ;;  %v1724_v57 = vsel %vm1060_vm0, %v2567_v30, %v2568_v25 }
 0x34b   : > { %2008 = vmatpush.msra.mxu2 %v1913_v45  ;;  %2028 = vmatpush.msrb.mxu3 %v1914_v22 }
 0x34c   : > { %v4440_v4 = vpop.permute.xlu1 %2605  ;;  %v4515_v52 = vpop.permute.xlu2 %2650 }
 0x34d   : > { %v4442_v5 = vpop.permute.xlu0 %2585  ;;  %2009 = vmatpush.msra.mxu2 %v1875_v28  ;;  %2029 = vmatpush.msrb.mxu3 %v1876_v29  ;;  %v2608_v22 = vunpack.i.h.bf16 %v4440_v4  ;;  %v2607_v28 = vunpack.i.l.bf16 %v4440_v4 }
 0x34e   : > { %v2588_v23 = vunpack.i.h.bf16 %v4442_v5  ;;  %v2587_v6 = vunpack.i.l.bf16 %v4442_v5 }
 0x350   : > { %v1837_v56 = vsel %vm1177_vm7, %v2548_v16, %v2587_v6  ;;  %v1838_v0 = vsel %vm1177_vm7, %v2587_v6, %v2588_v23  ;;  %v2562_v16 = vunpack.i.l.bf16 %v4416_v26 }
 0x351   : > { %2010 = vmatpush.msra.mxu2 %v1837_v56  ;;  %2030 = vmatpush.msrb.mxu3 %v1838_v0  ;;  %v1725_v56 = vsel %vm1060_vm0, %v2568_v25, %v2607_v28  ;;  %v1726_v0 = vsel %vm1060_vm0, %v2607_v28, %v2608_v22  ;;  %v2285_v25 = vld [vmem:[%s4679_s3 + $0x8] sm:$0xff] }
 0x352   : > { %v1685_v37 = vsel %vm1021_vm8, %v2523_v13, %v2562_v16  ;;  %v1686_v59 = vsel %vm1021_vm8, %v2562_v16, %v2563_v62  ;;  %1973 = vperm.xlu1 %2719, %v2285_v25   ;;  %2183 = vperm.xlu0 %2721, %v2285_v25  }
 0x353   : > { %2011 = vmatpush.msra.mxu2 %v1799_v36  ;;  %2031 = vmatpush.msrb.mxu3 %v1800_v31 }
 0x354   : > { %v4472_v43 = vpop.permute.xlu1 %2610  ;;  %2170 = vperm.xlu2 %2720, %v2285_v25  }
 0x355   : > { %2012 = vmatpush.msra.mxu2 %v1761_v60  ;;  %2032 = vmatpush.msrb.mxu3 %v1762_v33  ;;  %v4474_v14 = vpop.permute.xlu0 %2615  ;;  %v2613_v19 = vunpack.i.h.bf16 %v4472_v43  ;;  %v2612_v48 = vunpack.i.l.bf16 %v4472_v43 }
 0x356   : > { %v2618_v9 = vunpack.i.h.bf16 %v4474_v14  ;;  %v2617_v61 = vunpack.i.l.bf16 %v4474_v14 }
 0x357   : > { %2013 = vmatpush.msra.mxu2 %v1723_v39  ;;  %2033 = vmatpush.msrb.mxu3 %v1724_v57  ;;  %v1953_v21 = vsel %vm1294_vm1, %v2573_v15, %v2612_v48  ;;  %v1954_v2 = vsel %vm1294_vm1, %v2612_v48, %v2613_v19 }
 0x358   : > { %2047 = vmatpush.msra.mxu0 %v1953_v21  ;;  %2067 = vmatpush.msrb.mxu1 %v1954_v2  ;;  %v1915_v20 = vsel %vm1255_vm6, %v2578_v12, %v2617_v61  ;;  %v1916_v32 = vsel %vm1255_vm6, %v2617_v61, %v2618_v9 }
 0x359   : > { %2014 = vmatpush.msra.mxu2 %v1685_v37  ;;  %2034 = vmatpush.msrb.mxu3 %v1686_v59 }
 0x35a   : > { %2048 = vmatpush.msra.mxu0 %v1915_v20  ;;  %2068 = vmatpush.msrb.mxu1 %v1916_v32 }
 0x35b   : > { %2015 = vmatpush.msra.mxu2 %v4292_v40  ;;  %2035 = vmatpush.msrb.mxu3 %v4306_v58  ;;  %v2627_v40 = vunpack.i.l.bf16 %v4462_v63 }
 0x35c   : > { %v4509_v13 = vpop.permute.xlu1 %2630  ;;  %2289 = vmatmul.msk.f32.vlgmr.msra.gmra.mxu2 %vm1976_vm12, %v4505_v11  ;;  %2290 = vmatmul.msk.f32.vlgmr.msrb.gmra.mxu3 %vm1976_vm12, %v4505_v11 }
 0x35d   : > { %v4517_v8 = vpop.permute.xlu0 %2620  ;;  %v2633_v55 = vunpack.i.h.bf16 %v4509_v13  ;;  %v2632_v15 = vunpack.i.l.bf16 %v4509_v13  ;;  %v1839_v34 = vsel %vm1177_vm7, %v2588_v23, %v2627_v40  ;;  %v1840_v35 = vsel %vm1177_vm7, %v2627_v40, %v2628_v47  ;;  %v4555_v23 = vpop.permute.xlu2 %2670 }
 0x35e   : > { %v2623_v58 = vunpack.i.h.bf16 %v4517_v8  ;;  %v2622_v12 = vunpack.i.l.bf16 %v4517_v8  ;;  %v2653_v8 = vunpack.i.h.bf16 %v4515_v52 }
 0x35f   : > { %v1801_v50 = vsel %vm1138_vm4, %v2593_v7, %v2632_v15  ;;  %v2602_v7 = vunpack.i.l.bf16 %v4430_v24 }
 0x360   : > { %v1877_v17 = vsel %vm1216_vm5, %v2583_v42, %v2622_v12  ;;  %v1878_v49 = vsel %vm1216_vm5, %v2622_v12, %v2623_v58  ;;  %v1802_v42 = vsel %vm1138_vm4, %v2632_v15, %v2633_v55  ;;  %v2673_v12 = vunpack.i.h.bf16 %v4555_v23 }
 0x361   : > { %2049 = vmatpush.msra.mxu0 %v1877_v17  ;;  %2069 = vmatpush.msrb.mxu1 %v1878_v49  ;;  %v1687_v46 = vsel %vm1021_vm8, %v2563_v62, %v2602_v7  ;;  %v2672_v15 = vunpack.i.l.bf16 %v4555_v23 }
 0x363   : > { %2050 = vmatpush.msra.mxu0 %v1839_v34  ;;  %2070 = vmatpush.msrb.mxu1 %v1840_v35  ;;  %v1842_v23 = vsel %vm1177_vm7, %v2672_v15, %v2673_v12 }
 0x364   : > { %v4539_v45 = vpop.permute.xlu1 %2635 }
 0x365   : > { %v4549_v29 = vpop.permute.xlu0 %2640  ;;  %v2638_v5 = vunpack.i.h.bf16 %v4539_v45  ;;  %v2637_v10 = vunpack.i.l.bf16 %v4539_v45  ;;  %2051 = vmatpush.msra.mxu0 %v1801_v50  ;;  %2071 = vmatpush.msrb.mxu1 %v1802_v42  ;;  %v4583_v26 = vpop.permute.xlu2 %2680 }
 0x366   : > { %v2683_v50 = vunpack.i.h.bf16 %v4583_v26  ;;  %v2682_v42 = vunpack.i.l.bf16 %v4583_v26 }
 0x367   : > { %v1763_v6 = vsel %vm1099_vm3, %v2598_v44, %v2637_v10  ;;  %v1764_v41 = vsel %vm1099_vm3, %v2637_v10, %v2638_v5  ;;  %v1688_v44 = vsel %vm1021_vm8, %v2602_v7, %v2603_v51  ;;  %v1841_v7 = vsel %vm1177_vm7, %v2628_v47, %v2672_v15 }
 0x368   : > { %2052 = vmatpush.msra.mxu0 %v1763_v6  ;;  %2072 = vmatpush.msrb.mxu1 %v1764_v41  ;;  %v1804_v63 = vsel %vm1138_vm4, %v2682_v42, %v2683_v50 }
 0x36a   : > { %2053 = vmatpush.msra.mxu0 %v1725_v56  ;;  %2073 = vmatpush.msrb.mxu1 %v1726_v0 }
 0x36c   : > { %v4575_v30 = vpop.permute.xlu1 %2645  ;;  %2054 = vmatpush.msra.mxu0 %v1687_v46  ;;  %2074 = vmatpush.msrb.mxu1 %v1688_v44  ;;  %v1803_v46 = vsel %vm1138_vm4, %v2633_v55, %v2682_v42 }
 0x36d   : > { %v2666_v54 = vpop.permute.xlu0 %2665  ;;  %v2696_v39 = vpop.permute.xlu2 %2695 }
 0x36e   : > { %2055 = vmatpush.msra.mxu0 %v4309_v3  ;;  %2075 = vmatpush.msrb.mxu1 %v4320_v1  ;;  %v2668_v21 = vunpack.i.h.bf16 %v2666_v54  ;;  %v2667_v2 = vunpack.i.l.bf16 %v2666_v54  ;;  %v2698_v43 = vunpack.i.h.bf16 %v2696_v39  ;;  %v2697_v32 = vunpack.i.l.bf16 %v2696_v39 }
 0x36f   : > { %2291 = vmatmul.msk.f32.vlgmr.msra.gmra.mxu0 %vm1976_vm12, %v4505_v11  ;;  %2292 = vmatmul.msk.f32.vlgmr.msrb.gmra.mxu1 %vm1976_vm12, %v4505_v11  ;;  %v2643_v54 = vunpack.i.h.bf16 %v4549_v29 }
 0x370   : > { %v1879_v14 = vsel %vm1216_vm5, %v2623_v58, %v2667_v2  ;;  %v1881_v28 = vsel %vm1216_vm5, %v2668_v21, %v2697_v32  ;;  %v1882_v10 = vsel %vm1216_vm5, %v2697_v32, %v2698_v43  ;;  %v2652_v58 = vunpack.i.l.bf16 %v4515_v52 }
 0x371   : > { %v2642_v52 = vunpack.i.l.bf16 %v4549_v29 }
 0x372   : > { %v1728_v29 = vsel %vm1060_vm0, %v2652_v58, %v2653_v8 }
 0x373   : > { %v1689_v45 = vsel %vm1021_vm8, %v2603_v51, %v2642_v52 }
 0x374   : > { %v2656_v36 = vpop.permute.xlu1 %2655 }
 0x375   : > { %v2676_v31 = vpop.permute.xlu0 %2675  ;;  %v2658_v3 = vunpack.i.h.bf16 %v2656_v36  ;;  %v2657_v62 = vunpack.i.l.bf16 %v2656_v36  ;;  %v1727_v36 = vsel %vm1060_vm0, %v2608_v22, %v2652_v58 }
 0x376   : > { %v2678_v1 = vunpack.i.h.bf16 %v2676_v31  ;;  %v2677_v16 = vunpack.i.l.bf16 %v2676_v31  ;;  %v2711_v31 = vpop.permute.xlu2 %2710 }
 0x377   : > { %v1955_v60 = vsel %vm1294_vm1, %v2613_v19, %v2657_v62  ;;  %v1956_v33 = vsel %vm1294_vm1, %v2657_v62, %v2658_v3  ;;  %v2713_v62 = vunpack.i.h.bf16 %v2711_v31 }
 0x378   : > { %2087 = vmatpush.msrb.mxu2 %v1955_v60  ;;  %2107 = vmatpush.msra.mxu3 %v1956_v33  ;;  %v1957_v48 = vsel %vm1294_vm1, %v2658_v3, %v2677_v16  ;;  %v1958_v61 = vsel %vm1294_vm1, %v2677_v16, %v2678_v1  ;;  %v2712_v1 = vunpack.i.l.bf16 %v2711_v31 }
 0x379   : > { %2127 = vmatpush.msrb.mxu0 %v1957_v48  ;;  %2147 = vmatpush.msra.mxu1 %v1958_v61  ;;  %v2648_v48 = vunpack.i.h.bf16 %v4575_v30 }
 0x37a   : > { %v1768_v61 = vsel %vm1099_vm3, %v2712_v1, %v2713_v62 }
 0x37c   : > { %v2661_v57 = vpop.permute.xlu1 %2660 }
 0x37d   : > { %v2686_v37 = vpop.permute.xlu0 %2685  ;;  %v2663_v59 = vunpack.i.h.bf16 %v2661_v57  ;;  %v2662_v20 = vunpack.i.l.bf16 %v2661_v57 }
 0x37e   : > { %v2688_v19 = vunpack.i.h.bf16 %v2686_v37  ;;  %v2687_v40 = vunpack.i.l.bf16 %v2686_v37 }
 0x37f   : > { %v1917_v17 = vsel %vm1255_vm6, %v2618_v9, %v2662_v20  ;;  %v1918_v49 = vsel %vm1255_vm6, %v2662_v20, %v2663_v59  ;;  %v1880_v9 = vsel %vm1216_vm5, %v2667_v2, %v2668_v21 }
 0x380   : > { %2088 = vmatpush.msrb.mxu2 %v1917_v17  ;;  %2108 = vmatpush.msra.mxu3 %v1918_v49  ;;  %v1919_v34 = vsel %vm1255_vm6, %v2663_v59, %v2687_v40  ;;  %v1920_v35 = vsel %vm1255_vm6, %v2687_v40, %v2688_v19 }
 0x381   : > { %2128 = vmatpush.msrb.mxu0 %v1919_v34  ;;  %2148 = vmatpush.msra.mxu1 %v1920_v35 }
 0x382   : > { %2089 = vmatpush.msrb.mxu2 %v1879_v14  ;;  %2109 = vmatpush.msra.mxu3 %v1880_v9 }
 0x383   : > { %2129 = vmatpush.msrb.mxu0 %v1881_v28  ;;  %2149 = vmatpush.msra.mxu1 %v1882_v10 }
 0x384   : > { %v2691_v6 = vpop.permute.xlu1 %2690  ;;  %2090 = vmatpush.msrb.mxu2 %v1841_v7  ;;  %2110 = vmatpush.msra.mxu3 %v1842_v23 }
 0x385   : > { %v2701_v41 = vpop.permute.xlu0 %2700  ;;  %v2693_v56 = vunpack.i.h.bf16 %v2691_v6  ;;  %v2692_v0 = vunpack.i.l.bf16 %v2691_v6 }
 0x386   : > { %v2703_v44 = vunpack.i.h.bf16 %v2701_v41  ;;  %v2702_v47 = vunpack.i.l.bf16 %v2701_v41  ;;  %2091 = vmatpush.msrb.mxu2 %v1803_v46  ;;  %2111 = vmatpush.msra.mxu3 %v1804_v63 }
 0x387   : > { %v1765_v26 = vsel %vm1099_vm3, %v2638_v5, %v2692_v0  ;;  %v1766_v25 = vsel %vm1099_vm3, %v2692_v0, %v2693_v56  ;;  %v1690_v5 = vsel %vm1021_vm8, %v2642_v52, %v2643_v54 }
 0x388   : > { %2092 = vmatpush.msrb.mxu2 %v1765_v26  ;;  %2112 = vmatpush.msra.mxu3 %v1766_v25  ;;  %v1843_v13 = vsel %vm1177_vm7, %v2673_v12, %v2702_v47  ;;  %v1844_v55 = vsel %vm1177_vm7, %v2702_v47, %v2703_v44 }
 0x389   : > { %2130 = vmatpush.msrb.mxu0 %v1843_v13  ;;  %2150 = vmatpush.msra.mxu1 %v1844_v55 }
 0x38a   : > { %2093 = vmatpush.msrb.mxu2 %v1727_v36  ;;  %2113 = vmatpush.msra.mxu3 %v1728_v29 }
 0x38c   : > { %v2706_v3 = vpop.permute.xlu1 %2705  ;;  %2094 = vmatpush.msrb.mxu2 %v1689_v45  ;;  %2114 = vmatpush.msra.mxu3 %v1690_v5 }
 0x38d   : > { %v2716_v16 = vpop.permute.xlu0 %2715  ;;  %v2708_v4 = vunpack.i.h.bf16 %v2706_v3  ;;  %v2707_v60 = vunpack.i.l.bf16 %v2706_v3 }
 0x38e   : > { %2095 = vmatpush.msrb.mxu2 %v4323_v18  ;;  %2115 = vmatpush.msra.mxu3 %v4340_v53  ;;  %v2718_v22 = vunpack.i.h.bf16 %v2716_v16  ;;  %v2717_v33 = vunpack.i.l.bf16 %v2716_v16  ;;  %v2647_v18 = vunpack.i.l.bf16 %v4575_v30  ;;  %v1767_v53 = vsel %vm1099_vm3, %v2693_v56, %v2712_v1 }
 0x38f   : > { %v1805_v24 = vsel %vm1138_vm4, %v2683_v50, %v2707_v60  ;;  %v1806_v51 = vsel %vm1138_vm4, %v2707_v60, %v2708_v4  ;;  %2293 = vmatmul.msk.f32.vlgmr.msrb.gmra.mxu2 %vm1976_vm12, %v4505_v11  ;;  %2294 = vmatmul.msk.f32.vlgmr.msra.gmra.mxu3 %vm1976_vm12, %v4505_v11 }
 0x390   : > { %2131 = vmatpush.msrb.mxu0 %v1805_v24  ;;  %2151 = vmatpush.msra.mxu1 %v1806_v51  ;;  %v1729_v39 = vsel %vm1060_vm0, %v2653_v8, %v2717_v33  ;;  %v1730_v57 = vsel %vm1060_vm0, %v2717_v33, %v2718_v22  ;;  %v1691_v21 = vsel %vm1021_vm8, %v2643_v54, %v2647_v18 }
 0x391   : > { %v1692_v2 = vsel %vm1021_vm8, %v2647_v18, %v2648_v48 }
 0x392   : > { %2132 = vmatpush.msrb.mxu0 %v1767_v53  ;;  %2152 = vmatpush.msra.mxu1 %v1768_v61 }
 0x394   : > { %2133 = vmatpush.msrb.mxu0 %v1729_v39  ;;  %2153 = vmatpush.msra.mxu1 %v1730_v57 }
 0x396   : > { %2134 = vmatpush.msrb.mxu0 %v1691_v21  ;;  %2154 = vmatpush.msra.mxu1 %v1692_v2 }
 0x398   : > { %2135 = vmatpush.msrb.mxu0 %v4337_v38  ;;  %2155 = vmatpush.msra.mxu1 %v4349_v27 }
 0x399   : > { %2295 = vmatmul.msk.f32.vlgmr.msrb.gmra.mxu0 %vm1976_vm12, %v4505_v11  ;;  %2296 = vmatmul.msk.f32.vlgmr.msra.gmra.mxu1 %vm1976_vm12, %v4505_v11 }
 0x3a5   : > { %v1997_v30 = vpop.f32.mrf.mxu1 }
 0x3ae   : > { %v2171_v40 = vpop.permute.xlu2 %2170 }
 0x3c4   : > { %v1974_v20 = vpop.permute.xlu1 %1973  ;;  %v2184_v17 = vpop.permute.xlu0 %2183 }
 0x3c5   : > { %v1998_v43 = vadd.f32 %v1997_v30, %v1974_v20 }
 0x3c7   : > { %v2160_v12 = vmax.f32 %v1998_v43, 0.0 }
 0x3c9   : > { %v2173_v27 = vmul.f32 %v2171_v40, %v2160_v12 }
 0x3cb   : > { %v2186_v11 = vadd.f32 %v2184_v17, %v2173_v27 }
 0x3cd   : > { %2195 = vst [vmem:[%s4662_s30] sm:$0xff] %v2186_v11 }
 0x3df   : > { %v2017_v37 = vpop.f32.mrf.mxu2  ;;  %v2037_v59 = vpop.f32.mrf.mxu3 }
 0x3e0   : > { %v2018_v32 = vadd.f32 %v2017_v37, %v1974_v20  ;;  %v2038_v19 = vadd.f32 %v2037_v59, %v1974_v20 }
 0x3e2   : > { %v2161_v15 = vmax.f32 %v2018_v32, 0.0  ;;  %v2162_v38 = vmax.f32 %v2038_v19, 0.0 }
 0x3e4   : > { %v2174_v49 = vmul.f32 %v2171_v40, %v2161_v15  ;;  %v2175_v34 = vmul.f32 %v2171_v40, %v2162_v38 }
 0x3e6   : > { %v2187_v35 = vadd.f32 %v2184_v17, %v2174_v49  ;;  %v2188_v50 = vadd.f32 %v2184_v17, %v2175_v34 }
 0x3e8   : > { %2196 = vst [vmem:[%s4662_s30 + $0x8] sm:$0xff] %v2187_v35 }
 0x3e9   : > { %2197 = vst [vmem:[%s4662_s30 + $0x10] sm:$0xff] %v2188_v50 }
 0x3ec   : > { %v2057_v42 = vpop.f32.mrf.mxu0  ;;  %v2077_v14 = vpop.f32.mrf.mxu1 }
 0x3ed   : > { %v2058_v9 = vadd.f32 %v2057_v42, %v1974_v20  ;;  %v2078_v28 = vadd.f32 %v2077_v14, %v1974_v20 }
 0x3ef   : > { %v2163_v10 = vmax.f32 %v2058_v9, 0.0  ;;  %v2164_v7 = vmax.f32 %v2078_v28, 0.0 }
 0x3f1   : > { %v2176_v23 = vmul.f32 %v2171_v40, %v2163_v10  ;;  %v2177_v8 = vmul.f32 %v2171_v40, %v2164_v7 }
 0x3f3   : > { %v2189_v58 = vadd.f32 %v2184_v17, %v2176_v23  ;;  %v2190_v6 = vadd.f32 %v2184_v17, %v2177_v8 }
 0x3f5   : > { %2198 = vst [vmem:[%s4662_s30 + $0x18] sm:$0xff] %v2189_v58 }
 0x3f6   : > { %2199 = vst [vmem:[%s4662_s30 + $0x20] sm:$0xff] %v2190_v6 }
 0x412   : > { %v2097_v41 = vpop.f32.mrf.mxu2  ;;  %v2117_v56 = vpop.f32.mrf.mxu3 }
 0x413   : > { %v2098_v0 = vadd.f32 %v2097_v41, %v1974_v20  ;;  %v2118_v46 = vadd.f32 %v2117_v56, %v1974_v20 }
 0x415   : > { %v2165_v63 = vmax.f32 %v2098_v0, 0.0  ;;  %v2166_v44 = vmax.f32 %v2118_v46, 0.0 }
 0x416   : > { %v2137_v47 = vpop.f32.mrf.mxu0  ;;  %v2157_v54 = vpop.f32.mrf.mxu1 }
 0x417   : > { %v2178_v52 = vmul.f32 %v2171_v40, %v2165_v63  ;;  %v2179_v26 = vmul.f32 %v2171_v40, %v2166_v44  ;;  %v2138_v25 = vadd.f32 %v2137_v47, %v1974_v20  ;;  %v2158_v13 = vadd.f32 %v2157_v54, %v1974_v20 }
 0x419   : > { %v2191_v55 = vadd.f32 %v2184_v17, %v2178_v52  ;;  %v2192_v36 = vadd.f32 %v2184_v17, %v2179_v26  ;;  %v2167_v29 = vmax.f32 %v2138_v25, 0.0  ;;  %v2168_v31 = vmax.f32 %v2158_v13, 0.0 }
 0x41b   : > { %2200 = vst [vmem:[%s4662_s30 + $0x28] sm:$0xff] %v2191_v55  ;;  %v2180_v45 = vmul.f32 %v2171_v40, %v2167_v29  ;;  %v2181_v5 = vmul.f32 %v2171_v40, %v2168_v31 }
 0x41c   : > { %2201 = vst [vmem:[%s4662_s30 + $0x30] sm:$0xff] %v2192_v36 }
 0x41d   : > { %v2193_v3 = vadd.f32 %v2184_v17, %v2180_v45  ;;  %v2194_v62 = vadd.f32 %v2184_v17, %v2181_v5 }
 0x41f   : > { %2202 = vst [vmem:[%s4662_s30 + $0x38] sm:$0xff] %v2193_v3 }
 0x420   : > { %2203 = vst [vmem:[%s4662_s30 + $0x40] sm:$0xff] %v2194_v62 }
 0x421 PF: > { %s16_s21 = sadd.s32 1, %s2731_s21  }
 0x422   : > { %p13_p4 = scmp.ge.s32.totalorder %s16_s21, 4  }
 0x424   :  { %15 = sbr.rel (!%p13_p4) target bundleno = 1 (0x1), region = 75 }

</bundles_post_ra>
